<compile_context>
chip_gen: v7x
topology: tpu7x:2x2x1
jax: 0.10.0
libtpu: 0.0.40
codegen_flags: <defaults>
</compile_context>

<pallas_src>
import functools

import jax
import jax.numpy as jnp
from jax.experimental import pallas as pl
from jax.experimental.pallas import tpu as pltpu


# ----------------------------------------------------------------------------- hyper-params

N_ATOMS = 37            # atom37 representation
D_FEAT = N_ATOMS * 3    # 111
D_FEAT_PAD = 128        # pad contraction dim to a full lane tile
D_EMB = 32              # encoder embedding / codebook dim
N_CODES = 64            # codebook size
N_CODES_PAD = 128       # padded (lane-dense) codebook size
D_S = 32                # s_s (single-rep) dim
D_Z = 16                # s_z (pair-rep) dim
N_DISTO = 64            # distogram bins
N_AATYPE = 24           # lm logits classes
N_PLDDT = 50            # plddt bins

# fused decoder-head column layout inside the 256-wide slab
_OFF_LM = 0
_OFF_LEFT = _OFF_LM + N_AATYPE          # 24
_OFF_RIGHT = _OFF_LEFT + D_Z            # 40
_OFF_FRAME = _OFF_RIGHT + D_Z           # 56
_OFF_ANG = _OFF_FRAME + 7               # 63
_OFF_POS = _OFF_ANG + 14                # 77
_OFF_PLDDT = _OFF_POS + 42              # 119
_N_HEADS = _OFF_PLDDT + N_PLDDT         # 169
_N_HEADS_PAD = 256

_VMEM_LIMIT = 48 * 1024 * 1024          # safe on v5e/v6e (128 MiB) and v7x (64 MiB)


def _round_up(x, m):
    return (x + m - 1) // m * m


def _compiler_params(n_parallel_axes):
    return pltpu.CompilerParams(
        dimension_semantics=("parallel",) * n_parallel_axes,
        vmem_limit_bytes=_VMEM_LIMIT,
    )


# ----------------------------------------------------------------------------- kernels

def _linear_kernel(*refs, activation, has_mask):
    """y = act(x @ w + b) [* mask]; bf16 MXU inputs, f32 accumulation, M-tiled."""
    if has_mask:
        x_ref, w_ref, b_ref, m_ref, o_ref = refs
    else:
        x_ref, w_ref, b_ref, o_ref = refs
    y = jnp.dot(x_ref[...].astype(jnp.bfloat16),
                w_ref[...].astype(jnp.bfloat16),
                preferred_element_type=jnp.float32) + b_ref[...]
    if activation == "gelu":
        y = jax.nn.gelu(y, approximate=True)
    elif activation == "relu":
        y = jnp.maximum(y, 0.0)
    if has_mask:
        y = y * m_ref[...]
    o_ref[...] = y.astype(o_ref.dtype)


def linear(x, w, b, activation=None, mask=None, tile_m=512):
    """Row-tiled dense layer; weights/bias resident across the grid."""
    M, K = x.shape
    _, N = w.shape
    TM = min(tile_m, _round_up(M, 8))
    Mp = _round_up(M, TM)
    if Mp != M:
        x = jnp.pad(x, ((0, Mp - M), (0, 0)))
        if mask is not None:
            mask = jnp.pad(mask, ((0, Mp - M), (0, 0)))
    has_mask = mask is not None

    in_specs = [
        pl.BlockSpec((TM, K), lambda i: (i, 0)),
        pl.BlockSpec((K, N), lambda i: (0, 0)),
        pl.BlockSpec((1, N), lambda i: (0, 0)),
    ]
    args = [x, w, b.reshape(1, N)]
    if has_mask:
        in_specs.append(pl.BlockSpec((TM, 1), lambda i: (i, 0)))
        args.append(mask)

    out = pl.pallas_call(
        functools.partial(_linear_kernel, activation=activation, has_mask=has_mask),
        out_shape=jax.ShapeDtypeStruct((Mp, N), jnp.float32),
        grid=(Mp // TM,),
        in_specs=in_specs,
        out_specs=pl.BlockSpec((TM, N), lambda i: (i, 0)),
        compiler_params=_compiler_params(1),
    )(*args)
    return out[:M]


def _vq_kernel(x_ref, c_ref, logits_ref, prob_ref, idx_ref, qx_ref, *, n_codes):
    """Vector quantization on a row tile: squared distances (bf16 MXU), masked softmax
    over the padded 128-wide codebook, argmin, and exact f32 codebook lookup."""
    x = x_ref[...]                                   # (TM, D) f32
    c = c_ref[...]                                   # (Kp, D) f32 (rows >= n_codes are pads)
    kp = c.shape[0]

    x2 = jnp.sum(x * x, axis=-1, keepdims=True)      # (TM, 1)
    c2 = jnp.sum(c * c, axis=-1, keepdims=True).T    # (1, Kp)
    xc = jax.lax.dot_general(                        # (TM, Kp) bf16-in / f32-acc on the MXU
        x.astype(jnp.bfloat16), c.astype(jnp.bfloat16),
        dimension_numbers=(((1,), (1,)), ((), ())),
        preferred_element_type=jnp.float32)
    d = x2 - 2.0 * xc + c2                           # squared distances

    code_iota = jax.lax.broadcasted_iota(jnp.int32, d.shape, 1)
    valid = code_iota < n_codes
    d = jnp.where(valid, d, jnp.float32(1e30))       # pad codes never win
    logits = -d
    logits_ref[...] = logits

    m = jnp.max(logits, axis=-1, keepdims=True)
    e = jnp.where(valid, jnp.exp(logits - m), 0.0)
    inv = pl.reciprocal(jnp.sum(e, axis=-1, keepdims=True), approx=True)
    prob_ref[...] = e * inv

    min_d = jnp.min(d, axis=-1, keepdims=True)
    idx = jnp.min(jnp.where(d <= min_d, code_iota, kp), axis=-1).astype(jnp.int32)
    idx_ref[...] = idx[:, None]

    onehot = (idx[:, None] == code_iota).astype(jnp.float32)          # (TM, Kp)
    # exact (f32) codebook lookup so quantized vectors keep full precision
    qx_ref[...] = jnp.dot(onehot, c, preferred_element_type=jnp.float32)


def vector_quantize(x, codebook, tile_m=512):
    M, D = x.shape
    K, Dc = codebook.shape
    assert D == Dc
    kp = N_CODES_PAD
    cb = jnp.pad(codebook, ((0, kp - K), (0, 0)))
    TM = min(tile_m, _round_up(M, 8))
    Mp = _round_up(M, TM)
    if Mp != M:
        x = jnp.pad(x, ((0, Mp - M), (0, 0)))

    logits, prob, idx, qx = pl.pallas_call(
        functools.partial(_vq_kernel, n_codes=K),
        out_shape=(
            jax.ShapeDtypeStruct((Mp, kp), jnp.float32),   # logits (lane-dense, 128 wide)
            jax.ShapeDtypeStruct((Mp, kp), jnp.float32),   # prob
            jax.ShapeDtypeStruct((Mp, 1), jnp.int32),      # idx
            jax.ShapeDtypeStruct((Mp, D), jnp.float32),    # qx
        ),
        grid=(Mp // TM,),
        in_specs=[
            pl.BlockSpec((TM, D), lambda i: (i, 0)),
            pl.BlockSpec((kp, D), lambda i: (0, 0)),       # codebook resident
        ],
        out_specs=(
            pl.BlockSpec((TM, kp), lambda i: (i, 0)),
            pl.BlockSpec((TM, kp), lambda i: (i, 0)),
            pl.BlockSpec((TM, 1), lambda i: (i, 0)),
            pl.BlockSpec((TM, D), lambda i: (i, 0)),
        ),
        compiler_params=_compiler_params(1),
    )(x, cb)
    return logits[:M, :K], prob[:M, :K], idx[:M], qx[:M]


def _decoder_trunk_kernel(qx_ref, ssw_ref, ssb_ref, hw_ref, hb_ref, ss_ref, heads_ref):
    """s_s = gelu(qx @ ss_w + ss_b); heads = s_s @ W_heads + b_heads (256-wide, lane-dense)."""
    ss = jnp.dot(qx_ref[...].astype(jnp.bfloat16),
                 ssw_ref[...].astype(jnp.bfloat16),
                 preferred_element_type=jnp.float32) + ssb_ref[...]
    ss = jax.nn.gelu(ss, approximate=True)
    ss_ref[...] = ss
    heads = jnp.dot(ss.astype(jnp.bfloat16),
                    hw_ref[...].astype(jnp.bfloat16),
                    preferred_element_type=jnp.float32) + hb_ref[...]
    heads_ref[...] = heads


def decoder_trunk(qx, ss_w, ss_b, heads_w, heads_b, tile_m=512):
    M, D = qx.shape
    _, DS = ss_w.shape
    _, NH = heads_w.shape
    TM = min(tile_m, _round_up(M, 8))
    Mp = _round_up(M, TM)
    if Mp != M:
        qx = jnp.pad(qx, ((0, Mp - M), (0, 0)))

    ss, heads = pl.pallas_call(
        _decoder_trunk_kernel,
        out_shape=(
            jax.ShapeDtypeStruct((Mp, DS), jnp.float32),
            jax.ShapeDtypeStruct((Mp, NH), jnp.float32),
        ),
        grid=(Mp // TM,),
        in_specs=[
            pl.BlockSpec((TM, D), lambda i: (i, 0)),
            pl.BlockSpec((D, DS), lambda i: (0, 0)),
            pl.BlockSpec((1, DS), lambda i: (0, 0)),
            pl.BlockSpec((DS, NH), lambda i: (0, 0)),
            pl.BlockSpec((1, NH), lambda i: (0, 0)),
        ],
        out_specs=(
            pl.BlockSpec((TM, DS), lambda i: (i, 0)),
            pl.BlockSpec((TM, NH), lambda i: (i, 0)),
        ),
        compiler_params=_compiler_params(1),
    )(qx, ss_w, ss_b.reshape(1, DS), heads_w, heads_b.reshape(1, NH))
    return ss[:M], heads[:M]


def _pair_disto_kernel(left_ref, right_ref, w_ref, b_ref, z_ref, dg_ref):
    """Fused pairwise outer-sum + distogram projection: the s_z tile never leaves VMEM
    before being matmul'd against disto_w."""
    li = left_ref[0]                                   # (TL, Dz)
    rj = right_ref[0]                                  # (L, Dz)
    z = li[:, None, :] + rj[None, :, :]                # (TL, L, Dz)
    z_ref[0] = z
    tl, l, dz = z.shape
    dg = jnp.dot(z.reshape(tl * l, dz).astype(jnp.bfloat16),
                 w_ref[...].astype(jnp.bfloat16),
                 preferred_element_type=jnp.float32) + b_ref[...]
    dg_ref[0] = dg.reshape(tl, l, dg.shape[-1])


def pair_distogram(left, right, w, b, tile_l=64):
    B, L, Dz = left.shape
    _, N = w.shape
    TL = min(tile_l, L)
    if L % TL != 0:
        TL = L   # TODO(synk): pad L for non-divisible i-tiles at large sequence lengths
    grid = (B, L // TL)

    z, dg = pl.pallas_call(
        _pair_disto_kernel,
        out_shape=(
            jax.ShapeDtypeStruct((B, L, L, Dz), jnp.float32),
            jax.ShapeDtypeStruct((B, L, L, N), jnp.float32),
        ),
        grid=grid,
        in_specs=[
            pl.BlockSpec((1, TL, Dz), lambda bb, ii: (bb, ii, 0)),
            pl.BlockSpec((1, L, Dz), lambda bb, ii: (bb, 0, 0)),
            pl.BlockSpec((Dz, N), lambda bb, ii: (0, 0)),
            pl.BlockSpec((1, N), lambda bb, ii: (0, 0)),
        ],
        out_specs=(
            pl.BlockSpec((1, TL, L, Dz), lambda bb, ii: (bb, ii, 0, 0)),
            pl.BlockSpec((1, TL, L, N), lambda bb, ii: (bb, ii, 0, 0)),
        ),
        compiler_params=_compiler_params(2),
    )(left, right, w, b.reshape(1, N))
    return z, dg


# ----------------------------------------------------------------------------- model

def init_params(key):
    ks = jax.random.split(key, 12)

    def w(k, shape, scale=0.05):
        return (scale * jax.random.normal(k, shape)).astype(jnp.float32)

    return {
        "enc_w":    w(ks[0], (D_FEAT, D_EMB)),
        "enc_b":    jnp.zeros((D_EMB,), jnp.float32),
        "codebook": w(ks[1], (N_CODES, D_EMB), scale=0.2),
        "ss_w":     w(ks[2], (D_EMB, D_S)),
        "ss_b":     jnp.zeros((D_S,), jnp.float32),
        "lm_w":     w(ks[3], (D_S, N_AATYPE)),
        "lm_b":     jnp.zeros((N_AATYPE,), jnp.float32),
        "left_w":   w(ks[4], (D_S, D_Z)),
        "left_b":   jnp.zeros((D_Z,), jnp.float32),
        "right_w":  w(ks[5], (D_S, D_Z)),
        "right_b":  jnp.zeros((D_Z,), jnp.float32),
        "disto_w":  w(ks[6], (D_Z, N_DISTO)),
        "disto_b":  jnp.zeros((N_DISTO,), jnp.float32),
        "frame_w":  w(ks[7], (D_S, 7)),
        "frame_b":  jnp.zeros((7,), jnp.float32),
        "ang_w":    w(ks[8], (D_S, 14)),
        "ang_b":    jnp.zeros((14,), jnp.float32),
        "pos_w":    w(ks[9], (D_S, 14 * 3)),
        "pos_b":    jnp.zeros((14 * 3,), jnp.float32),
        "plddt_w":  w(ks[10], (D_S, N_PLDDT)),
        "plddt_b":  jnp.zeros((N_PLDDT,), jnp.float32),
    }


def structure_tokenizer_forward(params, atom_positions, aatype, attention_mask,
                                residue_index, num_recycles=None):
    # TODO(synk): num_recycles accepted but unused (no recycled folding trunk here).
    B, L = aatype.shape
    M = B * L
    mask = attention_mask.astype(jnp.float32)                      # (B, L)
    mask_flat = mask.reshape(M, 1)

    # ----------------------- encoder (Equiformer-like featurizer + VQ) -----------------
    feat = atom_positions.reshape(M, D_FEAT).astype(jnp.float32)
    feat = jnp.pad(feat, ((0, 0), (0, D_FEAT_PAD - D_FEAT)))       # K: 111 -> 128 (zeros)
    enc_w = jnp.pad(params["enc_w"], ((0, D_FEAT_PAD - D_FEAT), (0, 0)))
    # mask multiply is fused into the encoder linear kernel
    emb_flat = linear(feat, enc_w, params["enc_b"], activation="gelu", mask=mask_flat)

    logits_flat, prob_flat, idx_flat, qx_flat = vector_quantize(emb_flat, params["codebook"])

    # glue reductions (tiny): commitment loss, perplexity, dead codes
    denom = jnp.maximum(jnp.sum(mask_flat), 1.0)
    commitment_loss = jnp.sum(((emb_flat - qx_flat) ** 2) * mask_flat) / (denom * D_EMB)
    avg_prob = jnp.sum(prob_flat * mask_flat, axis=0) / denom
    ppl = jnp.exp(-jnp.sum(avg_prob * jnp.log(avg_prob + 1e-10)))
    idx = idx_flat.reshape(B, L)
    usage = jnp.sum(jax.nn.one_hot(idx_flat[:, 0], N_CODES) * mask_flat, axis=0)
    dead_codes = jnp.sum((usage == 0).astype(jnp.int32))

    raw_qx_flat = qx_flat   # TODO(synk): no straight-through estimator (inference-only)

    encoder_output = {
        "emb": emb_flat.reshape(B, L, D_EMB),
        "raw_qx": raw_qx_flat.reshape(B, L, D_EMB),
        "commitment_loss": commitment_loss,
        "logits": logits_flat.reshape(B, L, N_CODES),
        "idx": idx,
        "prob": prob_flat.reshape(B, L, N_CODES),
        "ppl": ppl,
        "dead_codes": dead_codes,
    }

    # ----------------------- decoder (ESMFold-like heads, fused) -----------------------
    heads_w = jnp.pad(
        jnp.concatenate([params["lm_w"], params["left_w"], params["right_w"],
                         params["frame_w"], params["ang_w"], params["pos_w"],
                         params["plddt_w"]], axis=1),
        ((0, 0), (0, _N_HEADS_PAD - _N_HEADS)))
    heads_b = jnp.pad(
        jnp.concatenate([params["lm_b"], params["left_b"], params["right_b"],
                         params["frame_b"], params["ang_b"], params["pos_b"],
                         params["plddt_b"]], axis=0),
        ((0, _N_HEADS_PAD - _N_HEADS),))

    s_s_flat, heads_flat = decoder_trunk(raw_qx_flat, params["ss_w"], params["ss_b"],
                                         heads_w, heads_b)

    lm_logits = heads_flat[:, _OFF_LM:_OFF_LM + N_AATYPE].reshape(B, L, N_AATYPE)
    left = heads_flat[:, _OFF_LEFT:_OFF_LEFT + D_Z].reshape(B, L, D_Z)
    right = heads_flat[:, _OFF_RIGHT:_OFF_RIGHT + D_Z].reshape(B, L, D_Z)
    frames = heads_flat[:, _OFF_FRAME:_OFF_FRAME + 7].reshape(B, L, 7)
    unnormalized_angles = heads_flat[:, _OFF_ANG:_OFF_ANG + 14].reshape(B, L, 7, 2)
    positions = heads_flat[:, _OFF_POS:_OFF_POS + 42].reshape(B, L, 14, 3)
    plddt_logits = heads_flat[:, _OFF_PLDDT:_OFF_PLDDT + N_PLDDT]        # (M, 50)

    # fused pairwise outer-sum + distogram projection (s_z never re-read from HBM)
    s_z, distogram_logits = pair_distogram(left, right,
                                           params["disto_w"], params["disto_b"])

    angles = unnormalized_angles / jnp.sqrt(
        jnp.sum(unnormalized_angles ** 2, axis=-1, keepdims=True) + 1e-8)

    bin_centers = (jnp.arange(N_PLDDT, dtype=jnp.float32) + 0.5) / N_PLDDT * 100.0
    plddt = jnp.sum(jax.nn.softmax(plddt_logits, axis=-1) * bin_centers, axis=-1).reshape(B, L)

    decoder_output = {
        "frames": frames,
        "unnormalized_angles": unnormalized_angles,
        "angles": angles,
        "positions": positions,
        "states": s_s_flat.reshape(B, L, D_S),
        "s_s": s_s_flat.reshape(B, L, D_S),
        "s_z": s_z,
        "distogram_logits": distogram_logits,
        "lm_logits": lm_logits,
        "aatype": aatype,
        "residue_index": residue_index,
        "plddt": plddt,
        "qx": raw_qx_flat.reshape(B, L, D_EMB),
    }

    output = dict()
    output.update(encoder_output)
    output.update(decoder_output)
    return output


# ----------------------------------------------------------------------------- main

if __name__ == "__main__":
    key = jax.random.PRNGKey(0)
    k_par, k_pos, k_aa = jax.random.split(key, 3)

    B, L = 2, 8
    params = init_params(k_par)

    atom_positions = jax.random.normal(k_pos, (B, L, N_ATOMS, 3), dtype=jnp.float32)
    aatype = jax.random.randint(k_aa, (B, L), 0, 20, dtype=jnp.int32)
    attention_mask = jnp.ones((B, L), dtype=jnp.float32)
    residue_index = jnp.broadcast_to(jnp.arange(L, dtype=jnp.int32), (B, L))

    fwd = jax.jit(functools.partial(structure_tokenizer_forward, params))
    out = fwd(atom_positions, aatype, attention_mask, residue_index)
    jax.block_until_ready(out)

    # light sanity checks on shapes
    assert out["raw_qx"].shape == (B, L, D_EMB)
    assert out["s_z"].shape == (B, L, L, D_Z)
    assert out["distogram_logits"].shape == (B, L, L, N_DISTO)
    assert out["positions"].shape == (B, L, 14, 3)
    assert out["idx"].shape == (B, L)
    assert out["lm_logits"].shape == (B, L, N_AATYPE)
    assert out["plddt"].shape == (B, L)

    print("KERNEL_OK")
</pallas_src>

<mosaic_0001>
module attributes {stable_mosaic.version = 11 : i64} {
  func.func @_linear_kernel(%arg0: i32, %arg1: memref<16x128xf32, #tpu.memory_space<vmem>>, %arg2: memref<128x32xf32, #tpu.memory_space<vmem>>, %arg3: memref<1x32xf32, #tpu.memory_space<vmem>>, %arg4: memref<16x1xf32, #tpu.memory_space<vmem>>, %arg5: memref<16x32xf32, #tpu.memory_space<vmem>>) attributes {dimension_semantics = [#tpu.dimension_semantics<parallel>], iteration_bounds = array<i64: 1>, scalar_prefetch = 0 : i64, scratch_operands = 0 : i64, tpu.core_type = #tpu.core_type<tc>, window_params = [{transform_indices = @transform_0, window_bounds = array<i64: 16, 128>}, {pipeline_mode = #tpu.pipeline_mode<synchronous>, transform_indices = @transform_1, window_bounds = array<i64: 128, 32>}, {pipeline_mode = #tpu.pipeline_mode<synchronous>, transform_indices = @transform_2, window_bounds = array<i64: 1, 32>}, {transform_indices = @transform_3, window_bounds = array<i64: 16, 1>}, {transform_indices = @transform_4, window_bounds = array<i64: 16, 32>}]} {
    %c0 = arith.constant 0 : index
    %c0_0 = arith.constant 0 : index
    %0 = vector.load %arg1[%c0, %c0_0] : memref<16x128xf32, #tpu.memory_space<vmem>>, vector<16x128xf32>
    %1 = arith.truncf %0 : vector<16x128xf32> to vector<16x128xbf16>
    %c0_1 = arith.constant 0 : index
    %c0_2 = arith.constant 0 : index
    %2 = vector.load %arg2[%c0_1, %c0_2] : memref<128x32xf32, #tpu.memory_space<vmem>>, vector<128x32xf32>
    %3 = arith.truncf %2 : vector<128x32xf32> to vector<128x32xbf16>
    %cst = arith.constant dense<0.000000e+00> : vector<16x32xf32>
    %4 = tpu.matmul %1, %3, %cst {dimension_numbers = #tpu.dot_dimension_numbers<[1], [0], [0], [1], [0, 0, 1, 1], [], []>} : vector<16x128xbf16>, vector<128x32xbf16>, vector<16x32xf32> -> vector<16x32xf32>
    %c0_3 = arith.constant 0 : index
    %c0_4 = arith.constant 0 : index
    %5 = vector.load %arg3[%c0_3, %c0_4] : memref<1x32xf32, #tpu.memory_space<vmem>>, vector<1x32xf32>
    %6 = vector.broadcast %5 : vector<1x32xf32> to vector<16x32xf32>
    %7 = arith.addf %4, %6 : vector<16x32xf32>
    %8 = arith.mulf %7, %7 : vector<16x32xf32>
    %9 = arith.mulf %7, %8 : vector<16x32xf32>
    %cst_5 = arith.constant 4.471500e-02 : f32
    %10 = vector.broadcast %cst_5 : f32 to vector<16x32xf32>
    %11 = arith.mulf %10, %9 : vector<16x32xf32>
    %12 = arith.addf %7, %11 : vector<16x32xf32>
    %cst_6 = arith.constant 0.797884583 : f32
    %13 = vector.broadcast %cst_6 : f32 to vector<16x32xf32>
    %14 = arith.mulf %13, %12 : vector<16x32xf32>
    %15 = math.tanh %14 : vector<16x32xf32>
    %cst_7 = arith.constant 1.000000e+00 : f32
    %16 = vector.broadcast %cst_7 : f32 to vector<16x32xf32>
    %17 = arith.addf %16, %15 : vector<16x32xf32>
    %cst_8 = arith.constant 5.000000e-01 : f32
    %18 = vector.broadcast %cst_8 : f32 to vector<16x32xf32>
    %19 = arith.mulf %18, %17 : vector<16x32xf32>
    %20 = arith.mulf %7, %19 : vector<16x32xf32>
    %c0_9 = arith.constant 0 : index
    %c0_10 = arith.constant 0 : index
    %21 = vector.load %arg4[%c0_9, %c0_10] : memref<16x1xf32, #tpu.memory_space<vmem>>, vector<16x1xf32>
    %22 = vector.broadcast %21 : vector<16x1xf32> to vector<16x32xf32>
    %23 = arith.mulf %20, %22 : vector<16x32xf32>
    %c0_11 = arith.constant 0 : index
    %c0_12 = arith.constant 0 : index
    %24 = vector.load %arg5[%c0_11, %c0_12] : memref<16x32xf32, #tpu.memory_space<vmem>>, vector<16x32xf32>
    tpu.vector_store %arg5[%c0_11, %c0_12], %23 {strides = array<i32>} : memref<16x32xf32, #tpu.memory_space<vmem>>, vector<16x32xf32>,
    return
  }
  func.func @transform_0(%arg0: i32) -> (i32, i32) {
    %c0_i32 = arith.constant 0 : i32
    %c0_i32_0 = arith.constant 0 : i32
    return %arg0, %c0_i32 : i32, i32
  }
  func.func @transform_1(%arg0: i32) -> (i32, i32) {
    %c0_i32 = arith.constant 0 : i32
    %c0_i32_0 = arith.constant 0 : i32
    %c0_i32_1 = arith.constant 0 : i32
    return %c0_i32, %c0_i32_0 : i32, i32
  }
  func.func @transform_2(%arg0: i32) -> (i32, i32) {
    %c0_i32 = arith.constant 0 : i32
    %c0_i32_0 = arith.constant 0 : i32
    %c0_i32_1 = arith.constant 0 : i32
    return %c0_i32, %c0_i32_0 : i32, i32
  }
  func.func @transform_3(%arg0: i32) -> (i32, i32) {
    %c0_i32 = arith.constant 0 : i32
    %c0_i32_0 = arith.constant 0 : i32
    return %arg0, %c0_i32 : i32, i32
  }
  func.func @transform_4(%arg0: i32) -> (i32, i32) {
    %c0_i32 = arith.constant 0 : i32
    %c0_i32_0 = arith.constant 0 : i32
    return %arg0, %c0_i32 : i32, i32
  }
}

module attributes {stable_mosaic.version = 11 : i64} {
  func.func @_vq_kernel(%arg0: i32, %arg1: memref<16x32xf32, #tpu.memory_space<vmem>>, %arg2: memref<128x32xf32, #tpu.memory_space<vmem>>, %arg3: memref<16x128xf32, #tpu.memory_space<vmem>>, %arg4: memref<16x128xf32, #tpu.memory_space<vmem>>, %arg5: memref<16x1xi32, #tpu.memory_space<vmem>>, %arg6: memref<16x32xf32, #tpu.memory_space<vmem>>) attributes {dimension_semantics = [#tpu.dimension_semantics<parallel>], iteration_bounds = array<i64: 1>, scalar_prefetch = 0 : i64, scratch_operands = 0 : i64, tpu.core_type = #tpu.core_type<tc>, window_params = [{transform_indices = @transform_0, window_bounds = array<i64: 16, 32>}, {pipeline_mode = #tpu.pipeline_mode<synchronous>, transform_indices = @transform_1, window_bounds = array<i64: 128, 32>}, {transform_indices = @transform_2, window_bounds = array<i64: 16, 128>}, {transform_indices = @transform_3, window_bounds = array<i64: 16, 128>}, {transform_indices = @transform_4, window_bounds = array<i64: 16, 1>}, {transform_indices = @transform_5, window_bounds = array<i64: 16, 32>}]} {
    %c0 = arith.constant 0 : index
    %c0_0 = arith.constant 0 : index
    %0 = vector.load %arg1[%c0, %c0_0] : memref<16x32xf32, #tpu.memory_space<vmem>>, vector<16x32xf32>
    %c0_1 = arith.constant 0 : index
    %c0_2 = arith.constant 0 : index
    %1 = vector.load %arg2[%c0_1, %c0_2] : memref<128x32xf32, #tpu.memory_space<vmem>>, vector<128x32xf32>
    %2 = arith.mulf %0, %0 : vector<16x32xf32>
    %cst = arith.constant dense<0.000000e+00> : vector<16xf32>
    %3 = vector.multi_reduction <add>, %2, %cst [1] : vector<16x32xf32> to vector<16xf32>
    %4 = vector.shape_cast %3 : vector<16xf32> to vector<16x1xf32>
    %5 = arith.mulf %1, %1 : vector<128x32xf32>
    %cst_3 = arith.constant dense<0.000000e+00> : vector<128xf32>
    %6 = vector.multi_reduction <add>, %5, %cst_3 [1] : vector<128x32xf32> to vector<128xf32>
    %7 = vector.shape_cast %6 : vector<128xf32> to vector<128x1xf32>
    %8 = tpu.transpose %7, [1, 0] : vector<128x1xf32> -> vector<1x128xf32>
    %9 = arith.truncf %0 : vector<16x32xf32> to vector<16x32xbf16>
    %10 = arith.truncf %1 : vector<128x32xf32> to vector<128x32xbf16>
    %cst_4 = arith.constant dense<0.000000e+00> : vector<16x128xf32>
    %11 = tpu.matmul %9, %10, %cst_4 {dimension_numbers = #tpu.dot_dimension_numbers<[1], [1], [0], [0], [0, 0, 1, 0], [], []>} : vector<16x32xbf16>, vector<128x32xbf16>, vector<16x128xf32> -> vector<16x128xf32>
    %cst_5 = arith.constant 2.000000e+00 : f32
    %12 = vector.broadcast %cst_5 : f32 to vector<16x128xf32>
    %13 = arith.mulf %12, %11 : vector<16x128xf32>
    %14 = vector.broadcast %4 : vector<16x1xf32> to vector<16x128xf32>
    %15 = arith.subf %14, %13 : vector<16x128xf32>
    %16 = vector.broadcast %8 : vector<1x128xf32> to vector<16x128xf32>
    %17 = arith.addf %15, %16 : vector<16x128xf32>
    %18 = tpu.iota {dimensions = array<i32: 1>} : vector<16x128xi32>
    %c64_i32 = arith.constant 64 : i32
    %19 = vector.broadcast %c64_i32 : i32 to vector<16x128xi32>
    %20 = arith.cmpi slt, %18, %19 : vector<16x128xi32>
    %cst_6 = arith.constant 1.000000e+30 : f32
    %21 = vector.broadcast %cst_6 : f32 to vector<16x128xf32>
    %22 = arith.select %20, %17, %21 : vector<16x128xi1>, vector<16x128xf32>
    %cst_7 = arith.constant 0.000000e+00 : f32
    %23 = vector.broadcast %cst_7 : f32 to vector<16x128xf32>
    %24 = arith.subf %23, %22 : vector<16x128xf32>
    %c0_8 = arith.constant 0 : index
    %c0_9 = arith.constant 0 : index
    %25 = vector.load %arg3[%c0_8, %c0_9] : memref<16x128xf32, #tpu.memory_space<vmem>>, vector<16x128xf32>
    tpu.vector_store %arg3[%c0_8, %c0_9], %24 {strides = array<i32>} : memref<16x128xf32, #tpu.memory_space<vmem>>, vector<16x128xf32>,
    %cst_10 = arith.constant dense<0xFF800000> : vector<16xf32>
    %26 = vector.multi_reduction <maximumf>, %24, %cst_10 [1] : vector<16x128xf32> to vector<16xf32>
    %27 = vector.shape_cast %26 : vector<16xf32> to vector<16x1xf32>
    %28 = vector.broadcast %27 : vector<16x1xf32> to vector<16x128xf32>
    %29 = arith.subf %24, %28 : vector<16x128xf32>
    %30 = math.exp %29 : vector<16x128xf32>
    %cst_11 = arith.constant 0.000000e+00 : f32
    %31 = vector.broadcast %cst_11 : f32 to vector<16x128xf32>
    %32 = arith.select %20, %30, %31 : vector<16x128xi1>, vector<16x128xf32>
    %cst_12 = arith.constant dense<0.000000e+00> : vector<16xf32>
    %33 = vector.multi_reduction <add>, %32, %cst_12 [1] : vector<16x128xf32> to vector<16xf32>
    %34 = vector.shape_cast %33 : vector<16xf32> to vector<16x1xf32>
    %35 = tpu.reciprocal %34 {approx = true} : vector<16x1xf32> -> vector<16x1xf32>
    %36 = vector.broadcast %35 : vector<16x1xf32> to vector<16x128xf32>
    %37 = arith.mulf %32, %36 : vector<16x128xf32>
    %c0_13 = arith.constant 0 : index
    %c0_14 = arith.constant 0 : index
    %38 = vector.load %arg4[%c0_13, %c0_14] : memref<16x128xf32, #tpu.memory_space<vmem>>, vector<16x128xf32>
    tpu.vector_store %arg4[%c0_13, %c0_14], %37 {strides = array<i32>} : memref<16x128xf32, #tpu.memory_space<vmem>>, vector<16x128xf32>,
    %cst_15 = arith.constant dense<0x7F800000> : vector<16xf32>
    %39 = vector.multi_reduction <minimumf>, %22, %cst_15 [1] : vector<16x128xf32> to vector<16xf32>
    %40 = vector.shape_cast %39 : vector<16xf32> to vector<16x1xf32>
    %41 = vector.broadcast %40 : vector<16x1xf32> to vector<16x128xf32>
    %42 = arith.cmpf ole, %22, %41 : vector<16x128xf32>
    %c128_i32 = arith.constant 128 : i32
    %43 = vector.broadcast %c128_i32 : i32 to vector<16x128xi32>
    %44 = arith.select %42, %18, %43 : vector<16x128xi1>, vector<16x128xi32>
    %cst_16 = arith.constant dense<2147483647> : vector<16xi32>
    %45 = vector.multi_reduction <minsi>, %44, %cst_16 [1] : vector<16x128xi32> to vector<16xi32>
    %46 = vector.shape_cast %45 : vector<16xi32> to vector<16x1xi32>
    %c0_17 = arith.constant 0 : index
    %c0_18 = arith.constant 0 : index
    %47 = vector.load %arg5[%c0_17, %c0_18] : memref<16x1xi32, #tpu.memory_space<vmem>>, vector<16x1xi32>
    tpu.vector_store %arg5[%c0_17, %c0_18], %46 {strides = array<i32>} : memref<16x1xi32, #tpu.memory_space<vmem>>, vector<16x1xi32>,
    %48 = vector.shape_cast %45 : vector<16xi32> to vector<16x1xi32>
    %49 = vector.broadcast %48 : vector<16x1xi32> to vector<16x128xi32>
    %50 = arith.cmpi eq, %49, %18 : vector<16x128xi32>
    %51 = arith.extui %50 : vector<16x128xi1> to vector<16x128xi32>
    %52 = arith.sitofp %51 : vector<16x128xi32> to vector<16x128xf32>
    %cst_19 = arith.constant dense<0.000000e+00> : vector<16x32xf32>
    %53 = tpu.matmul %52, %1, %cst_19 {dimension_numbers = #tpu.dot_dimension_numbers<[1], [0], [0], [1], [0, 0, 1, 1], [], []>} : vector<16x128xf32>, vector<128x32xf32>, vector<16x32xf32> -> vector<16x32xf32>
    %c0_20 = arith.constant 0 : index
    %c0_21 = arith.constant 0 : index
    %54 = vector.load %arg6[%c0_20, %c0_21] : memref<16x32xf32, #tpu.memory_space<vmem>>, vector<16x32xf32>
    tpu.vector_store %arg6[%c0_20, %c0_21], %53 {strides = array<i32>} : memref<16x32xf32, #tpu.memory_space<vmem>>, vector<16x32xf32>,
    return
  }
  func.func @transform_0(%arg0: i32) -> (i32, i32) {
    %c0_i32 = arith.constant 0 : i32
    %c0_i32_0 = arith.constant 0 : i32
    return %arg0, %c0_i32 : i32, i32
  }
  func.func @transform_1(%arg0: i32) -> (i32, i32) {
    %c0_i32 = arith.constant 0 : i32
    %c0_i32_0 = arith.constant 0 : i32
    %c0_i32_1 = arith.constant 0 : i32
    return %c0_i32, %c0_i32_0 : i32, i32
  }
  func.func @transform_2(%arg0: i32) -> (i32, i32) {
    %c0_i32 = arith.constant 0 : i32
    %c0_i32_0 = arith.constant 0 : i32
    return %arg0, %c0_i32 : i32, i32
  }
  func.func @transform_3(%arg0: i32) -> (i32, i32) {
    %c0_i32 = arith.constant 0 : i32
    %c0_i32_0 = arith.constant 0 : i32
    return %arg0, %c0_i32 : i32, i32
  }
  func.func @transform_4(%arg0: i32) -> (i32, i32) {
    %c0_i32 = arith.constant 0 : i32
    %c0_i32_0 = arith.constant 0 : i32
    return %arg0, %c0_i32 : i32, i32
  }
  func.func @transform_5(%arg0: i32) -> (i32, i32) {
    %c0_i32 = arith.constant 0 : i32
    %c0_i32_0 = arith.constant 0 : i32
    return %arg0, %c0_i32 : i32, i32
  }
}

module attributes {stable_mosaic.version = 11 : i64} {
  func.func @_decoder_trunk_kernel(%arg0: i32, %arg1: memref<16x32xf32, #tpu.memory_space<vmem>>, %arg2: memref<32x32xf32, #tpu.memory_space<vmem>>, %arg3: memref<1x32xf32, #tpu.memory_space<vmem>>, %arg4: memref<32x256xf32, #tpu.memory_space<vmem>>, %arg5: memref<1x256xf32, #tpu.memory_space<vmem>>, %arg6: memref<16x32xf32, #tpu.memory_space<vmem>>, %arg7: memref<16x256xf32, #tpu.memory_space<vmem>>) attributes {dimension_semantics = [#tpu.dimension_semantics<parallel>], iteration_bounds = array<i64: 1>, scalar_prefetch = 0 : i64, scratch_operands = 0 : i64, tpu.core_type = #tpu.core_type<tc>, window_params = [{transform_indices = @transform_0, window_bounds = array<i64: 16, 32>}, {pipeline_mode = #tpu.pipeline_mode<synchronous>, transform_indices = @transform_1, window_bounds = array<i64: 32, 32>}, {pipeline_mode = #tpu.pipeline_mode<synchronous>, transform_indices = @transform_2, window_bounds = array<i64: 1, 32>}, {pipeline_mode = #tpu.pipeline_mode<synchronous>, transform_indices = @transform_3, window_bounds = array<i64: 32, 256>}, {pipeline_mode = #tpu.pipeline_mode<synchronous>, transform_indices = @transform_4, window_bounds = array<i64: 1, 256>}, {transform_indices = @transform_5, window_bounds = array<i64: 16, 32>}, {transform_indices = @transform_6, window_bounds = array<i64: 16, 256>}]} {
    %c0 = arith.constant 0 : index
    %c0_0 = arith.constant 0 : index
    %0 = vector.load %arg1[%c0, %c0_0] : memref<16x32xf32, #tpu.memory_space<vmem>>, vector<16x32xf32>
    %1 = arith.truncf %0 : vector<16x32xf32> to vector<16x32xbf16>
    %c0_1 = arith.constant 0 : index
    %c0_2 = arith.constant 0 : index
    %2 = vector.load %arg2[%c0_1, %c0_2] : memref<32x32xf32, #tpu.memory_space<vmem>>, vector<32x32xf32>
    %3 = arith.truncf %2 : vector<32x32xf32> to vector<32x32xbf16>
    %cst = arith.constant dense<0.000000e+00> : vector<16x32xf32>
    %4 = tpu.matmul %1, %3, %cst {dimension_numbers = #tpu.dot_dimension_numbers<[1], [0], [0], [1], [0, 0, 1, 1], [], []>} : vector<16x32xbf16>, vector<32x32xbf16>, vector<16x32xf32> -> vector<16x32xf32>
    %c0_3 = arith.constant 0 : index
    %c0_4 = arith.constant 0 : index
    %5 = vector.load %arg3[%c0_3, %c0_4] : memref<1x32xf32, #tpu.memory_space<vmem>>, vector<1x32xf32>
    %6 = vector.broadcast %5 : vector<1x32xf32> to vector<16x32xf32>
    %7 = arith.addf %4, %6 : vector<16x32xf32>
    %8 = arith.mulf %7, %7 : vector<16x32xf32>
    %9 = arith.mulf %7, %8 : vector<16x32xf32>
    %cst_5 = arith.constant 4.471500e-02 : f32
    %10 = vector.broadcast %cst_5 : f32 to vector<16x32xf32>
    %11 = arith.mulf %10, %9 : vector<16x32xf32>
    %12 = arith.addf %7, %11 : vector<16x32xf32>
    %cst_6 = arith.constant 0.797884583 : f32
    %13 = vector.broadcast %cst_6 : f32 to vector<16x32xf32>
    %14 = arith.mulf %13, %12 : vector<16x32xf32>
    %15 = math.tanh %14 : vector<16x32xf32>
    %cst_7 = arith.constant 1.000000e+00 : f32
    %16 = vector.broadcast %cst_7 : f32 to vector<16x32xf32>
    %17 = arith.addf %16, %15 : vector<16x32xf32>
    %cst_8 = arith.constant 5.000000e-01 : f32
    %18 = vector.broadcast %cst_8 : f32 to vector<16x32xf32>
    %19 = arith.mulf %18, %17 : vector<16x32xf32>
    %20 = arith.mulf %7, %19 : vector<16x32xf32>
    %c0_9 = arith.constant 0 : index
    %c0_10 = arith.constant 0 : index
    %21 = vector.load %arg6[%c0_9, %c0_10] : memref<16x32xf32, #tpu.memory_space<vmem>>, vector<16x32xf32>
    tpu.vector_store %arg6[%c0_9, %c0_10], %20 {strides = array<i32>} : memref<16x32xf32, #tpu.memory_space<vmem>>, vector<16x32xf32>,
    %22 = arith.truncf %20 : vector<16x32xf32> to vector<16x32xbf16>
    %c0_11 = arith.constant 0 : index
    %c0_12 = arith.constant 0 : index
    %23 = vector.load %arg4[%c0_11, %c0_12] : memref<32x256xf32, #tpu.memory_space<vmem>>, vector<32x256xf32>
    %24 = arith.truncf %23 : vector<32x256xf32> to vector<32x256xbf16>
    %cst_13 = arith.constant dense<0.000000e+00> : vector<16x256xf32>
    %25 = tpu.matmul %22, %24, %cst_13 {dimension_numbers = #tpu.dot_dimension_numbers<[1], [0], [0], [1], [0, 0, 1, 1], [], []>} : vector<16x32xbf16>, vector<32x256xbf16>, vector<16x256xf32> -> vector<16x256xf32>
    %c0_14 = arith.constant 0 : index
    %c0_15 = arith.constant 0 : index
    %26 = vector.load %arg5[%c0_14, %c0_15] : memref<1x256xf32, #tpu.memory_space<vmem>>, vector<1x256xf32>
    %27 = vector.broadcast %26 : vector<1x256xf32> to vector<16x256xf32>
    %28 = arith.addf %25, %27 : vector<16x256xf32>
    %c0_16 = arith.constant 0 : index
    %c0_17 = arith.constant 0 : index
    %29 = vector.load %arg7[%c0_16, %c0_17] : memref<16x256xf32, #tpu.memory_space<vmem>>, vector<16x256xf32>
    tpu.vector_store %arg7[%c0_16, %c0_17], %28 {strides = array<i32>} : memref<16x256xf32, #tpu.memory_space<vmem>>, vector<16x256xf32>,
    return
  }
  func.func @transform_0(%arg0: i32) -> (i32, i32) {
    %c0_i32 = arith.constant 0 : i32
    %c0_i32_0 = arith.constant 0 : i32
    return %arg0, %c0_i32 : i32, i32
  }
  func.func @transform_1(%arg0: i32) -> (i32, i32) {
    %c0_i32 = arith.constant 0 : i32
    %c0_i32_0 = arith.constant 0 : i32
    %c0_i32_1 = arith.constant 0 : i32
    return %c0_i32, %c0_i32_0 : i32, i32
  }
  func.func @transform_2(%arg0: i32) -> (i32, i32) {
    %c0_i32 = arith.constant 0 : i32
    %c0_i32_0 = arith.constant 0 : i32
    %c0_i32_1 = arith.constant 0 : i32
    return %c0_i32, %c0_i32_0 : i32, i32
  }
  func.func @transform_3(%arg0: i32) -> (i32, i32) {
    %c0_i32 = arith.constant 0 : i32
    %c0_i32_0 = arith.constant 0 : i32
    %c0_i32_1 = arith.constant 0 : i32
    return %c0_i32, %c0_i32_0 : i32, i32
  }
  func.func @transform_4(%arg0: i32) -> (i32, i32) {
    %c0_i32 = arith.constant 0 : i32
    %c0_i32_0 = arith.constant 0 : i32
    %c0_i32_1 = arith.constant 0 : i32
    return %c0_i32, %c0_i32_0 : i32, i32
  }
  func.func @transform_5(%arg0: i32) -> (i32, i32) {
    %c0_i32 = arith.constant 0 : i32
    %c0_i32_0 = arith.constant 0 : i32
    return %arg0, %c0_i32 : i32, i32
  }
  func.func @transform_6(%arg0: i32) -> (i32, i32) {
    %c0_i32 = arith.constant 0 : i32
    %c0_i32_0 = arith.constant 0 : i32
    return %arg0, %c0_i32 : i32, i32
  }
}

module attributes {stable_mosaic.version = 11 : i64} {
  func.func @_pair_disto_kernel(%arg0: i32, %arg1: i32, %arg2: memref<1x8x16xf32, #tpu.memory_space<vmem>>, %arg3: memref<1x8x16xf32, #tpu.memory_space<vmem>>, %arg4: memref<16x64xf32, #tpu.memory_space<vmem>>, %arg5: memref<1x64xf32, #tpu.memory_space<vmem>>, %arg6: memref<1x8x8x16xf32, #tpu.memory_space<vmem>>, %arg7: memref<1x8x8x64xf32, #tpu.memory_space<vmem>>) attributes {dimension_semantics = [#tpu.dimension_semantics<parallel>, #tpu.dimension_semantics<parallel>], iteration_bounds = array<i64: 2, 1>, scalar_prefetch = 0 : i64, scratch_operands = 0 : i64, tpu.core_type = #tpu.core_type<tc>, window_params = [{transform_indices = @transform_0, window_bounds = array<i64: 1, 8, 16>}, {transform_indices = @transform_1, window_bounds = array<i64: 1, 8, 16>}, {pipeline_mode = #tpu.pipeline_mode<synchronous>, transform_indices = @transform_2, window_bounds = array<i64: 16, 64>}, {pipeline_mode = #tpu.pipeline_mode<synchronous>, transform_indices = @transform_3, window_bounds = array<i64: 1, 64>}, {transform_indices = @transform_4, window_bounds = array<i64: 1, 8, 8, 16>}, {transform_indices = @transform_5, window_bounds = array<i64: 1, 8, 8, 64>}]} {
    %c0 = arith.constant 0 : index
    %c0_0 = arith.constant 0 : index
    %c0_1 = arith.constant 0 : index
    %0 = vector.load %arg2[%c0, %c0_0, %c0_1] : memref<1x8x16xf32, #tpu.memory_space<vmem>>, vector<1x8x16xf32>
    %1 = vector.shape_cast %0 : vector<1x8x16xf32> to vector<8x16xf32>
    %c0_2 = arith.constant 0 : index
    %c0_3 = arith.constant 0 : index
    %c0_4 = arith.constant 0 : index
    %2 = vector.load %arg3[%c0_2, %c0_3, %c0_4] : memref<1x8x16xf32, #tpu.memory_space<vmem>>, vector<1x8x16xf32>
    %3 = vector.shape_cast %2 : vector<1x8x16xf32> to vector<8x16xf32>
    %4 = vector.shape_cast %1 : vector<8x16xf32> to vector<8x1x16xf32>
    %5 = vector.shape_cast %3 : vector<8x16xf32> to vector<1x8x16xf32>
    %6 = vector.broadcast %4 : vector<8x1x16xf32> to vector<8x8x16xf32>
    %7 = vector.broadcast %5 : vector<1x8x16xf32> to vector<8x8x16xf32>
    %8 = arith.addf %6, %7 : vector<8x8x16xf32>
    %c0_5 = arith.constant 0 : index
    %c0_6 = arith.constant 0 : index
    %c0_7 = arith.constant 0 : index
    %c0_8 = arith.constant 0 : index
    %9 = vector.load %arg6[%c0_5, %c0_6, %c0_7, %c0_8] : memref<1x8x8x16xf32, #tpu.memory_space<vmem>>, vector<1x8x8x16xf32>
    %10 = vector.shape_cast %9 : vector<1x8x8x16xf32> to vector<8x8x16xf32>
    %11 = vector.shape_cast %8 : vector<8x8x16xf32> to vector<1x8x8x16xf32>
    tpu.vector_store %arg6[%c0_5, %c0_6, %c0_7, %c0_8], %11 {strides = array<i32>} : memref<1x8x8x16xf32, #tpu.memory_space<vmem>>, vector<1x8x8x16xf32>,
    %12 = vector.shape_cast %8 : vector<8x8x16xf32> to vector<64x16xf32>
    %13 = arith.truncf %12 : vector<64x16xf32> to vector<64x16xbf16>
    %c0_9 = arith.constant 0 : index
    %c0_10 = arith.constant 0 : index
    %14 = vector.load %arg4[%c0_9, %c0_10] : memref<16x64xf32, #tpu.memory_space<vmem>>, vector<16x64xf32>
    %15 = arith.truncf %14 : vector<16x64xf32> to vector<16x64xbf16>
    %cst = arith.constant dense<0.000000e+00> : vector<64x64xf32>
    %16 = tpu.matmul %13, %15, %cst {dimension_numbers = #tpu.dot_dimension_numbers<[1], [0], [0], [1], [0, 0, 1, 1], [], []>} : vector<64x16xbf16>, vector<16x64xbf16>, vector<64x64xf32> -> vector<64x64xf32>
    %c0_11 = arith.constant 0 : index
    %c0_12 = arith.constant 0 : index
    %17 = vector.load %arg5[%c0_11, %c0_12] : memref<1x64xf32, #tpu.memory_space<vmem>>, vector<1x64xf32>
    %18 = vector.broadcast %17 : vector<1x64xf32> to vector<64x64xf32>
    %19 = arith.addf %16, %18 : vector<64x64xf32>
    %20 = vector.shape_cast %19 : vector<64x64xf32> to vector<8x8x64xf32>
    %c0_13 = arith.constant 0 : index
    %c0_14 = arith.constant 0 : index
    %c0_15 = arith.constant 0 : index
    %c0_16 = arith.constant 0 : index
    %21 = vector.load %arg7[%c0_13, %c0_14, %c0_15, %c0_16] : memref<1x8x8x64xf32, #tpu.memory_space<vmem>>, vector<1x8x8x64xf32>
    %22 = vector.shape_cast %21 : vector<1x8x8x64xf32> to vector<8x8x64xf32>
    %23 = vector.shape_cast %20 : vector<8x8x64xf32> to vector<1x8x8x64xf32>
    tpu.vector_store %arg7[%c0_13, %c0_14, %c0_15, %c0_16], %23 {strides = array<i32>} : memref<1x8x8x64xf32, #tpu.memory_space<vmem>>, vector<1x8x8x64xf32>,
    return
  }
  func.func @transform_0(%arg0: i32, %arg1: i32) -> (i32, i32, i32) {
    %c0_i32 = arith.constant 0 : i32
    %c0_i32_0 = arith.constant 0 : i32
    return %arg0, %arg1, %c0_i32 : i32, i32, i32
  }
  func.func @transform_1(%arg0: i32, %arg1: i32) -> (i32, i32, i32) {
    %c0_i32 = arith.constant 0 : i32
    %c0_i32_0 = arith.constant 0 : i32
    %c0_i32_1 = arith.constant 0 : i32
    return %arg0, %c0_i32, %c0_i32_0 : i32, i32, i32
  }
  func.func @transform_2(%arg0: i32, %arg1: i32) -> (i32, i32) {
    %c0_i32 = arith.constant 0 : i32
    %c0_i32_0 = arith.constant 0 : i32
    %c0_i32_1 = arith.constant 0 : i32
    return %c0_i32, %c0_i32_0 : i32, i32
  }
  func.func @transform_3(%arg0: i32, %arg1: i32) -> (i32, i32) {
    %c0_i32 = arith.constant 0 : i32
    %c0_i32_0 = arith.constant 0 : i32
    %c0_i32_1 = arith.constant 0 : i32
    return %c0_i32, %c0_i32_0 : i32, i32
  }
  func.func @transform_4(%arg0: i32, %arg1: i32) -> (i32, i32, i32, i32) {
    %c0_i32 = arith.constant 0 : i32
    %c0_i32_0 = arith.constant 0 : i32
    %c0_i32_1 = arith.constant 0 : i32
    return %arg0, %arg1, %c0_i32, %c0_i32_0 : i32, i32, i32, i32
  }
  func.func @transform_5(%arg0: i32, %arg1: i32) -> (i32, i32, i32, i32) {
    %c0_i32 = arith.constant 0 : i32
    %c0_i32_0 = arith.constant 0 : i32
    %c0_i32_1 = arith.constant 0 : i32
    return %arg0, %arg1, %c0_i32, %c0_i32_0 : i32, i32, i32, i32
  }
}

</mosaic_0001>

<bundles_post_ra>
// kernel: mul.22
= control target key start
LH: loop header
LB: loop body
LE: loop exit
PB: predicated region body
PF: predicated region fallthrough
CT: control target
= control target key end

     0   :  { %vm7_vm0 = vcmask 64512   ;;  %vm13_vm1 = vcmask 130112   ;;  %s39_s0 = inlined_call_operand.vmem [shape: f32[2,8], index: 0, kind: input, shape index: {}]   ;;  %s40_s1 = inlined_call_operand.vmem [shape: f32[16], index: 1, kind: output, shape index: {}]  }
   0x1   :  { %v4_v0 = vld [vmem:[%s39_s0] sm:$0x3]  ;;  %s22_s0 = smov 8  }
   0x2   :  { %5 = vst [vmem:[#allocation1] sm:$0x3] %v4_v0 }
   0x9   :  { %v10_v1 = vld [vmem:[#allocation1 + $0x1] sm:$0x1]   ;;  %v6_v2 = vld [vmem:[#allocation1] sm:$0x1]  }
   0xa   :  { %11 = vrot.lane.b32.xlu0 %v10_v1, %s22_s0  ;;  %8 = vst.msk [vmem:[#allocation0] sm:$0x1] %vm7_vm0, %v6_v2  }
  0x7c   :  { %v12_v3 = vpop.permute.xlu0 %11  }
  0x7d   :  { %14 = vst.msk [vmem:[#allocation0] sm:$0x1] %vm13_vm1, %v12_v3  }
  0x84   :  { %v18_v4 = vld [vmem:[#allocation0] sm:$0x1] }
  0x85   :  { %20 = vst [vmem:[%s40_s1] sm:$0x1] %v18_v4 }

// kernel: structure_tokenizer_forward.4
= control target key start
LH: loop header
LB: loop body
LE: loop exit
PB: predicated region body
PF: predicated region fallthrough
CT: control target
= control target key end

     0   :  { %v170_v0 = vmov 0.0   ;;  %vm171_vm0 = vmmov 0   ;;  %v172_v6 = vmov 0   ;;  %vm125_vm1 = vcmask 261120   ;;  %s267_s1 = inlined_call_operand.vmem [shape: f32[128,32], index: 1, kind: input, shape index: {}]   ;;  %s268_s3 = inlined_call_operand.vmem [shape: f32[16,1], index: 3, kind: input, shape index: {}]   ;;  %s269_s0 = inlined_call_operand.vmem [shape: f32[16,128], index: 0, kind: input, shape index: {}]   ;;  %s270_s2 = inlined_call_operand.vmem [shape: f32[1,32], index: 2, kind: input, shape index: {}]   ;;  %s271_s4 = inlined_call_operand.vmem [shape: f32[16,32], index: 4, kind: output, shape index: {}]  }
   0x1   :  { %142 = vmatprep.subr.bf16.mxu0 %v170_v0  ;;  %v21_v1 = vld [vmem:[%s267_s1] sm:$0xff]  ;;  %v22_v2 = vld [vmem:[%s267_s1 + $0x8] sm:$0xff]  ;;  %v23_v3 = vld [vmem:[%s267_s1 + $0x10] sm:$0xff]  ;;  %158 = vmatprep.mubr.msk.bf16.mxu0 %vm171_vm0, %v170_v0 }
   0x2   :  { %v37_v4 = vpack.c.bf16 %v22_v2, %v21_v1  ;;  %v24_v5 = vld [vmem:[%s267_s1 + $0x18] sm:$0xff]  ;;  %165 = vset.pattern.permute.xlu0 %v172_v6  ;;  %v25_v8 = vld [vmem:[%s267_s1 + $0x20] sm:$0xff]  ;;  %v26_v9 = vld [vmem:[%s267_s1 + $0x28] sm:$0xff] }
   0x3   :  { %v38_v7 = vpack.c.bf16 %v24_v5, %v23_v3  ;;  %v111_v10 = vld [vmem:[%s268_s3] sm:$0xff]  ;;  %v39_v11 = vpack.c.bf16 %v26_v9, %v25_v8  ;;  %v27_v12 = vld [vmem:[%s267_s1 + $0x30] sm:$0xff]  ;;  %v28_v13 = vld [vmem:[%s267_s1 + $0x38] sm:$0xff] }
   0x4   :  { %143 = vmatpush3.bf16.msra.mxu0 %v37_v4  ;;  %115 = vperm.xlu0 %165, %v111_v10   ;;  %v112_v14 = vld [vmem:[%s268_s3 + $0x8] sm:$0xff]  ;;  %v40_v15 = vpack.c.bf16 %v28_v13, %v27_v12  ;;  %v29_v16 = vld [vmem:[%s267_s1 + $0x40] sm:$0xff]  ;;  %v31_v19 = vld [vmem:[%s267_s1 + $0x50] sm:$0xff] }
   0x5   :  { %144 = vmatprep.subr.bf16.mxu0 %v170_v0  ;;  %v30_v17 = vld [vmem:[%s267_s1 + $0x48] sm:$0xff]  ;;  %v32_v20 = vld [vmem:[%s267_s1 + $0x58] sm:$0xff]  ;;  %v33_v22 = vld [vmem:[%s267_s1 + $0x60] sm:$0xff] }
   0x6   :  { %v41_v18 = vpack.c.bf16 %v30_v17, %v29_v16  ;;  %v42_v21 = vpack.c.bf16 %v32_v20, %v31_v19  ;;  %v34_v23 = vld [vmem:[%s267_s1 + $0x68] sm:$0xff]  ;;  %v35_v25 = vld [vmem:[%s267_s1 + $0x70] sm:$0xff]  ;;  %v36_v26 = vld [vmem:[%s267_s1 + $0x78] sm:$0xff] }
   0x7   :  { %v43_v24 = vpack.c.bf16 %v34_v23, %v33_v22  ;;  %v44_v27 = vpack.c.bf16 %v36_v26, %v35_v25  ;;  %v18_v28 = vld [vmem:[%s269_s0] sm:$0xff]  ;;  %v19_v29 = vld [vmem:[%s269_s0 + $0x8] sm:$0xff] }
   0x8   :  { %145 = vmatpush3.bf16.msra.mxu0 %v38_v7  ;;  %120 = vperm.xlu0 %165, %v112_v14   ;;  %v20_v30 = vpack.c.bf16 %v19_v29, %v18_v28  ;;  %v132_v31 = vld [vmem:[%s270_s2] ss:$0 sm:$0xff] }
   0x9   :  { %146 = vmatprep.subr.bf16.mxu0 %v170_v0 }
   0xc   :  { %147 = vmatpush3.bf16.msra.mxu0 %v39_v11 }
   0xd   :  { %148 = vmatprep.subr.bf16.mxu0 %v170_v0 }
  0x10   :  { %149 = vmatpush3.bf16.msra.mxu0 %v40_v15 }
  0x11   :  { %150 = vmatprep.subr.bf16.mxu0 %v170_v0 }
  0x14   :  { %151 = vmatpush3.bf16.msra.mxu0 %v41_v18 }
  0x15   :  { %152 = vmatprep.subr.bf16.mxu0 %v170_v0 }
  0x18   :  { %153 = vmatpush3.bf16.msra.mxu0 %v42_v21 }
  0x19   :  { %154 = vmatprep.subr.bf16.mxu0 %v170_v0 }
  0x1c   :  { %155 = vmatpush3.bf16.msra.mxu0 %v43_v24 }
  0x1d   :  { %156 = vmatprep.subr.bf16.mxu0 %v170_v0 }
  0x20   :  { %157 = vmatpush3.bf16.msra.mxu0 %v44_v27 }
  0x23   :  { %159 = vmatmul.mubr.bf16.vlgmr.msra.gmra.mrb[0].mxu0 %v20_v30 }
  0x83   :  { %v116_v51 = vpop.permute.xlu0 %115 }
  0x87   :  { %v121_v58 = vpop.permute.xlu0 %120 }
  0xf6   :  { %v86_v32 = vpop.f32.mrb[0].mxu0 }
  0xf7   :  { %v87_v33 = vadd.f32 %v132_v31, %v86_v32  ;;  %v160_v34 = vpop.f32.mrb[1].mxu0 }
  0xf8   :  { %v89_v35 = vpop.f32.mrb[2].mxu0 }
  0xf9   :  { %v93_v36 = vmul.f32 %v87_v33, %v87_v33  ;;  %v90_v37 = vadd.f32 %v132_v31, %v89_v35  ;;  %v161_v38 = vpop.f32.mrb[3].mxu0 }
  0xfb   :  { %v95_v39 = vmul.f32 %v93_v36, %v87_v33  ;;  %v94_v40 = vmul.f32 %v90_v37, %v90_v37 }
  0xfd   :  { %v97_v41 = vmul.f32 0.044715, %v95_v39  ;;  %v96_v42 = vmul.f32 %v94_v40, %v90_v37 }
  0xff   :  { %v99_v43 = vadd.f32 %v97_v41, %v87_v33  ;;  %v98_v44 = vmul.f32 0.044715, %v96_v42 }
 0x101   :  { %v100_v45 = vadd.f32 %v98_v44, %v90_v37  ;;  %v101_v46 = vmul.f32 0.7978846, %v99_v43 }
 0x103   :  { %166 = vtanh.f32 %v101_v46  ;;  %v102_v47 = vmul.f32 0.7978846, %v100_v45 }
 0x105   :  { %168 = vtanh.f32 %v102_v47 }
 0x10d   :  { %v167_v48 = vpop.eup %166 }
 0x10e   :  { %v105_v49 = vadd.f32 1.0, %v167_v48 }
 0x10f   :  { %v169_v50 = vpop.eup %168 }
 0x110   :  { %v107_v52 = vmul.f32 0.5, %v105_v49  ;;  %v106_v53 = vadd.f32 1.0, %v169_v50 }
 0x112   :  { %v109_v54 = vmul.f32 %v107_v52, %v87_v33  ;;  %v108_v55 = vmul.f32 0.5, %v106_v53 }
 0x114   :  { %v123_v56 = vmul.f32 %v116_v51, %v109_v54  ;;  %v110_v57 = vmul.f32 %v108_v55, %v90_v37 }
 0x116   :  { %126 = vst.msk [vmem:[%s271_s4] sm:$0xff] %vm125_vm1, %v123_v56  ;;  %v124_v59 = vmul.f32 %v121_v58, %v110_v57 }
 0x118   :  { %127 = vst.msk [vmem:[%s271_s4 + $0x8] sm:$0xff] %vm125_vm1, %v124_v59 }

// kernel: structure_tokenizer_forward.6
= control target key start
LH: loop header
LB: loop body
LE: loop exit
PB: predicated region body
PF: predicated region fallthrough
CT: control target
= control target key end

     0   :  { %v208_v0 = vmov 0.0   ;;  %vm209_vm0 = vmmov 0   ;;  %vm39_vm1 = vcmask 261120   ;;  %v210_v22 = vmov 0   ;;  %s316_s1 = inlined_call_operand.vmem [shape: f32[32,32], index: 1, kind: input, shape index: {}]   ;;  %s317_s0 = inlined_call_operand.vmem [shape: f32[16,32], index: 0, kind: input, shape index: {}]   ;;  %s318_s3 = inlined_call_operand.vmem [shape: f32[32,256], index: 3, kind: input, shape index: {}]   ;;  %s319_s2 = inlined_call_operand.vmem [shape: f32[1,32], index: 2, kind: input, shape index: {}]   ;;  %s320_s5 = inlined_call_operand.vmem [shape: f32[16,32], index: 5, kind: output, shape index: {0}]   ;;  %s321_s4 = inlined_call_operand.vmem [shape: f32[1,256], index: 4, kind: input, shape index: {}]   ;;  %s322_s6 = inlined_call_operand.vmem [shape: f32[16,256], index: 6, kind: output, shape index: {1}]  }
   0x1   :  { %193 = vmatprep.subr.bf16.mxu0 %v208_v0  ;;  %v26_v1 = vld [vmem:[%s316_s1] sm:$0xff]  ;;  %v27_v2 = vld [vmem:[%s316_s1 + $0x8] sm:$0xff]  ;;  %v28_v3 = vld [vmem:[%s316_s1 + $0x10] sm:$0xff]  ;;  %197 = vmatprep.mubr.msk.bf16.mxu0 %vm209_vm0, %v208_v0  ;;  %v119_v49 = vlaneseq }
   0x2   :  { %v30_v4 = vpack.c.bf16 %v27_v2, %v26_v1  ;;  %v29_v5 = vld [vmem:[%s316_s1 + $0x18] sm:$0xff]  ;;  %v23_v7 = vld [vmem:[%s317_s0] sm:$0xff]  ;;  %v24_v8 = vld [vmem:[%s317_s0 + $0x8] sm:$0xff]  ;;  %164 = vmatprep.mubr.bf16.mxu1 %v210_v22 }
   0x3   :  { %v31_v6 = vpack.c.bf16 %v29_v5, %v28_v3  ;;  %v25_v9 = vpack.c.bf16 %v24_v8, %v23_v7  ;;  %v106_v10 = vld [vmem:[%s318_s3 + $0x8] sm:$0xff]  ;;  %v108_v11 = vld [vmem:[%s318_s3 + $0x18] sm:$0xff]  ;;  %v105_v13 = vld [vmem:[%s318_s3] sm:$0xff]  ;;  %v120_v50 = vshrl.u32 %v119_v49, 7 }
   0x4   :  { %194 = vmatpush3.bf16.msra.mxu0 %v30_v4  ;;  %v114_v12 = vpack.c.bf16 %v108_v11, %v106_v10  ;;  %v107_v14 = vld [vmem:[%s318_s3 + $0x10] sm:$0xff]  ;;  %v110_v16 = vld [vmem:[%s318_s3 + $0x28] sm:$0xff]  ;;  %v112_v17 = vld [vmem:[%s318_s3 + $0x38] sm:$0xff] }
   0x5   :  { %195 = vmatprep.subr.bf16.mxu0 %v208_v0  ;;  %v113_v15 = vpack.c.bf16 %v107_v14, %v105_v13  ;;  %v116_v18 = vpack.c.bf16 %v112_v17, %v110_v16  ;;  %v109_v19 = vld [vmem:[%s318_s3 + $0x20] sm:$0xff]  ;;  %v111_v20 = vld [vmem:[%s318_s3 + $0x30] sm:$0xff]  ;;  %v121_v51 = vsub.s32 0, %v120_v50  ;;  %v125_v53 = vsub.s32 1, %v120_v50 }
   0x6   :  { %132 = vmatprep.subr.bf16.mxu1 %v114_v12  ;;  %v115_v21 = vpack.c.bf16 %v111_v20, %v109_v19  ;;  %v187_v23 = vld [vmem:[%s319_s2] ss:$0 sm:$0xff] }
   0x7   :  { %133 = vmatpush1.bf16.msra.mxu1 %v113_v15  ;;  %v117_v52 = vld [vmem:[%s321_s4] sm:$0x3] }
   0x8   :  { %196 = vmatpush3.bf16.msra.mxu0 %v31_v6  ;;  %134 = vmatprep.subr.bf16.mxu1 %v116_v18  ;;  %v122_v54 = vrot.slane %v117_v52, %v121_v51  ;;  %v126_v55 = vrot.slane %v117_v52, %v125_v53 }
   0xb   :  { %198 = vmatmul.mubr.msk.bf16.vlgmr.msra.gmra.mrb[0].mxu0 %vm39_vm1, %v25_v9  ;;  %135 = vmatpush1.bf16.msra.mxu1 %v115_v21 }
  0xde   :  { %v77_v24 = vpop.f32.mrb[0].mxu0 }
  0xdf   :  { %v78_v25 = vadd.f32 %v187_v23, %v77_v24  ;;  %v199_v26 = vpop.f32.mrb[1].mxu0 }
  0xe0   :  { %v80_v27 = vpop.f32.mrb[2].mxu0 }
  0xe1   :  { %v84_v28 = vmul.f32 %v78_v25, %v78_v25  ;;  %v81_v29 = vadd.f32 %v187_v23, %v80_v27  ;;  %v200_v30 = vpop.f32.mrb[3].mxu0 }
  0xe3   :  { %v86_v31 = vmul.f32 %v84_v28, %v78_v25  ;;  %v85_v32 = vmul.f32 %v81_v29, %v81_v29 }
  0xe5   :  { %v88_v33 = vmul.f32 0.044715, %v86_v31  ;;  %v87_v34 = vmul.f32 %v85_v32, %v81_v29 }
  0xe7   :  { %v90_v35 = vadd.f32 %v88_v33, %v78_v25  ;;  %v89_v36 = vmul.f32 0.044715, %v87_v34 }
  0xe9   :  { %v92_v37 = vmul.f32 0.7978846, %v90_v35  ;;  %v91_v38 = vadd.f32 %v89_v36, %v81_v29 }
  0xeb   :  { %204 = vtanh.f32 %v92_v37  ;;  %v93_v39 = vmul.f32 0.7978846, %v91_v38 }
  0xed   :  { %206 = vtanh.f32 %v93_v39 }
  0xf5   :  { %v205_v40 = vpop.eup %204 }
  0xf6   :  { %v96_v41 = vadd.f32 1.0, %v205_v40 }
  0xf7   :  { %v207_v42 = vpop.eup %206 }
  0xf8   :  { %v98_v43 = vmul.f32 0.5, %v96_v41  ;;  %v97_v44 = vadd.f32 1.0, %v207_v42 }
  0xfa   :  { %v100_v45 = vmul.f32 %v98_v43, %v78_v25  ;;  %v99_v46 = vmul.f32 0.5, %v97_v44 }
  0xfc   :  { %102 = vst.msk [vmem:[%s320_s5] sm:$0xff] %vm39_vm1, %v100_v45  ;;  %v101_v47 = vmul.f32 %v99_v46, %v81_v29 }
  0xfe   :  { %103 = vst.msk [vmem:[%s320_s5 + $0x8] sm:$0xff] %vm39_vm1, %v101_v47  ;;  %v104_v48 = vpack.c.bf16 %v101_v47, %v100_v45 }
 0x100   :  { %189 = vmatmul.mubr.msk.bf16.vlgmr.msra.gmra.mrb[0].mxu1 %vm39_vm1, %v104_v48 }
 0x1d3   :  { %v166_v56 = vpop.f32.mrb[0].mxu1 }
 0x1d4   :  { %v167_v57 = vadd.f32 %v166_v56, %v122_v54  ;;  %v168_v58 = vpop.f32.mrb[1].mxu1 }
 0x1d5   :  { %v169_v59 = vadd.f32 %v168_v58, %v126_v55  ;;  %v170_v60 = vpop.f32.mrb[2].mxu1 }
 0x1d6   :  { %175 = vst [vmem:[%s322_s6] sm:$0xff] %v167_v57  ;;  %v171_v61 = vadd.f32 %v170_v60, %v122_v54  ;;  %v172_v62 = vpop.f32.mrb[3].mxu1 }
 0x1d7   :  { %176 = vst [vmem:[%s322_s6 + $0x8] sm:$0xff] %v169_v59  ;;  %v173_v63 = vadd.f32 %v172_v62, %v126_v55 }
 0x1d8   :  { %177 = vst [vmem:[%s322_s6 + $0x10] sm:$0xff] %v171_v61 }
 0x1d9   :  { %178 = vst [vmem:[%s322_s6 + $0x18] sm:$0xff] %v173_v63 }

// kernel: structure_tokenizer_forward.5
= control target key start
LH: loop header
LB: loop body
LE: loop exit
PB: predicated region body
PF: predicated region fallthrough
CT: control target
= control target key end

     0   :  { %v525_v0 = vmov 0.0   ;;  %vm36_vm0 = vcmask 261120   ;;  %vm526_vm1 = vmmov 0   ;;  %vm293_vm7 = vcmask 7168   ;;  %s689_s1 = inlined_call_operand.vmem [shape: f32[128,32], index: 1, kind: input, shape index: {}]   ;;  %s690_s0 = inlined_call_operand.vmem [shape: f32[16,32], index: 0, kind: input, shape index: {}]   ;;  %s691_s2 = inlined_call_operand.vmem [shape: f32[16,128], index: 2, kind: output, shape index: {0}]   ;;  %s692_s4 = inlined_call_operand.vmem [shape: s32[16,1], index: 4, kind: output, shape index: {2}]   ;;  %s693_s3 = inlined_call_operand.vmem [shape: f32[16,128], index: 3, kind: output, shape index: {1}]   ;;  %s694_s5 = inlined_call_operand.vmem [shape: f32[16,32], index: 5, kind: output, shape index: {3}]  }
   0x1   :  { %427 = vmatprep.subr.bf16.mxu0 %v525_v0  ;;  %v18_v1 = vld [vmem:[%s689_s1] sm:$0xff]  ;;  %v19_v2 = vld [vmem:[%s689_s1 + $0x8] sm:$0xff]  ;;  %v20_v3 = vld [vmem:[%s689_s1 + $0x10] sm:$0xff]  ;;  %443 = vmatprep.mubr.msk.bf16.mxu0 %vm526_vm1, %v525_v0 }
   0x2   :  { %v140_v4 = vpack.c.bf16 %v19_v2, %v18_v1  ;;  %v43_v5 = vmul.f32 %v18_v1, %v18_v1  ;;  %v21_v6 = vld [vmem:[%s689_s1 + $0x18] sm:$0xff]  ;;  %v44_v7 = vmul.f32 %v19_v2, %v19_v2  ;;  %v45_v8 = vmul.f32 %v20_v3, %v20_v3  ;;  %v22_v13 = vld [vmem:[%s689_s1 + $0x20] sm:$0xff]  ;;  %v23_v16 = vld [vmem:[%s689_s1 + $0x28] sm:$0xff] }
   0x3   :  { %v46_v9 = vmul.f32 %v21_v6, %v21_v6  ;;  %v141_v14 = vpack.c.bf16 %v21_v6, %v20_v3  ;;  %v47_v17 = vmul.f32 %v22_v13, %v22_v13  ;;  %v48_v19 = vmul.f32 %v23_v16, %v23_v16  ;;  %v24_v20 = vld [vmem:[%s689_s1 + $0x30] sm:$0xff]  ;;  %v25_v24 = vld [vmem:[%s689_s1 + $0x38] sm:$0xff]  ;;  %v26_v28 = vld [vmem:[%s689_s1 + $0x40] sm:$0xff] }
   0x4   :  { %v152_v10 = vsel %vm36_vm0, %v140_v4, 0  ;;  %v59_v11 = vsel %vm36_vm0, %v43_v5, 0.0  ;;  %v65_v12 = vsel %vm36_vm0, %v45_v8, 0.0  ;;  %483 = vmatprep.subr.bf16.mxu1 %v140_v4  ;;  %v62_v15 = vsel %vm36_vm0, %v44_v7, 0.0  ;;  %v27_v31 = vld [vmem:[%s689_s1 + $0x48] sm:$0xff]  ;;  %v28_v35 = vld [vmem:[%s689_s1 + $0x50] sm:$0xff] }
   0x5   :  { %428 = vmatpush3.bf16.xpose.msra.mxu0 %v152_v10  ;;  %60 = vadd.xlane.f32.xlu0 %v59_v11  ;;  %v68_v18 = vsel %vm36_vm0, %v46_v9, 0.0  ;;  %v155_v21 = vsel %vm36_vm0, %v141_v14, 0  ;;  %v142_v22 = vpack.c.bf16 %v23_v16, %v22_v13  ;;  %v71_v23 = vsel %vm36_vm0, %v47_v17, 0.0  ;;  %v29_v39 = vld [vmem:[%s689_s1 + $0x58] sm:$0xff]  ;;  %v30_v43 = vld [vmem:[%s689_s1 + $0x60] sm:$0xff]  ;;  %v31_v46 = vld [vmem:[%s689_s1 + $0x68] sm:$0xff] }
   0x6   :  { %429 = vmatprep.subr.bf16.mxu0 %v525_v0  ;;  %66 = vadd.xlane.f32.xlu1 %v65_v12  ;;  %v49_v25 = vmul.f32 %v24_v20, %v24_v20  ;;  %v74_v26 = vsel %vm36_vm0, %v48_v19, 0.0  ;;  %v50_v27 = vmul.f32 %v25_v24, %v25_v24  ;;  %v143_v29 = vpack.c.bf16 %v25_v24, %v24_v20  ;;  %v32_v50 = vld [vmem:[%s689_s1 + $0x70] sm:$0xff]  ;;  %v33_v54 = vld [vmem:[%s689_s1 + $0x78] sm:$0xff]  ;;  %v16_v58 = vld [vmem:[%s690_s0] sm:$0xff] }
   0x7   :  { %485 = vmatpush3.bf16.msra.mxu1 %v140_v4  ;;  %v51_v32 = vmul.f32 %v26_v28, %v26_v28  ;;  %v52_v34 = vmul.f32 %v27_v31, %v27_v31  ;;  %v158_v36 = vsel %vm36_vm0, %v142_v22, 0  ;;  %v144_v37 = vpack.c.bf16 %v27_v31, %v26_v28  ;;  %v17_v61 = vld [vmem:[%s690_s0 + $0x8] sm:$0xff] }
   0x8   :  { %487 = vmatprep.subr.bf16.mxu1 %v141_v14  ;;  %v77_v30 = vsel %vm36_vm0, %v49_v25, 0.0  ;;  %v80_v33 = vsel %vm36_vm0, %v50_v27, 0.0  ;;  %v53_v40 = vmul.f32 %v28_v35, %v28_v35  ;;  %v54_v42 = vmul.f32 %v29_v39, %v29_v39 }
   0x9   :  { %63 = vadd.xlane.f32.xlu0 %v62_v15  ;;  %v83_v38 = vsel %vm36_vm0, %v51_v32, 0.0  ;;  %v86_v41 = vsel %vm36_vm0, %v52_v34, 0.0  ;;  %v145_v44 = vpack.c.bf16 %v29_v39, %v28_v35  ;;  %v55_v47 = vmul.f32 %v30_v43, %v30_v43 }
   0xa   :  { %69 = vadd.xlane.f32.xlu1 %v68_v18  ;;  %v89_v45 = vsel %vm36_vm0, %v53_v40, 0.0  ;;  %v92_v48 = vsel %vm36_vm0, %v54_v42, 0.0  ;;  %v56_v49 = vmul.f32 %v31_v46, %v31_v46  ;;  %v161_v51 = vsel %vm36_vm0, %v143_v29, 0 }
   0xb   :  { %489 = vmatpush3.bf16.msra.mxu1 %v141_v14  ;;  %v146_v52 = vpack.c.bf16 %v31_v46, %v30_v43  ;;  %v95_v53 = vsel %vm36_vm0, %v55_v47, 0.0  ;;  %v57_v55 = vmul.f32 %v32_v50, %v32_v50  ;;  %v58_v57 = vmul.f32 %v33_v54, %v33_v54 }
   0xc   :  { %491 = vmatprep.subr.bf16.mxu1 %v142_v22  ;;  %v98_v56 = vsel %vm36_vm0, %v56_v49, 0.0  ;;  %v147_v59 = vpack.c.bf16 %v33_v54, %v32_v50  ;;  %v34_v62 = vmul.f32 %v16_v58, %v16_v58  ;;  %v35_v1 = vmul.f32 %v17_v61, %v17_v61 }
   0xd   :  { %430 = vmatpush3.bf16.xpose.msra.mxu0 %v155_v21  ;;  %72 = vadd.xlane.f32.xlu0 %v71_v23  ;;  %v101_v60 = vsel %vm36_vm0, %v57_v55, 0.0  ;;  %v104_v63 = vsel %vm36_vm0, %v58_v57, 0.0  ;;  %v164_v2 = vsel %vm36_vm0, %v144_v37, 0  ;;  %v167_v5 = vsel %vm36_vm0, %v145_v44, 0 }
   0xe   :  { %431 = vmatprep.subr.bf16.mxu0 %v525_v0  ;;  %75 = vadd.xlane.f32.xlu1 %v74_v26  ;;  %v37_v3 = vsel %vm36_vm0, %v34_v62, 0.0  ;;  %v40_v4 = vsel %vm36_vm0, %v35_v1, 0.0  ;;  %v170_v6 = vsel %vm36_vm0, %v146_v52, 0  ;;  %v173_v7 = vsel %vm36_vm0, %v147_v59, 0 }
   0xf   :  { %493 = vmatpush3.bf16.msra.mxu1 %v142_v22  ;;  %v139_v8 = vpack.c.bf16 %v17_v61, %v16_v58  ;;  %v220_v24 = vlaneseq }
  0x10   :  { %495 = vmatprep.subr.bf16.mxu1 %v143_v29 }
  0x11   :  { %78 = vadd.xlane.f32.xlu0 %v77_v30  ;;  %v221_v25 = vshrl.u32 %v220_v24, 7  ;;  %v648_v30 = vand.u32 127, %v220_v24 }
  0x12   :  { %81 = vadd.xlane.f32.xlu1 %v80_v33 }
  0x13   :  { %497 = vmatpush3.bf16.msra.mxu1 %v143_v29  ;;  %v222_v27 = vsub.s32 0, %v221_v25  ;;  %vm228_vm2 = vcmp.lt.s32.totalorder %v648_v30, 64 }
  0x14   :  { %499 = vmatprep.subr.bf16.mxu1 %v144_v37 }
  0x15   :  { %432 = vmatpush3.bf16.xpose.msra.mxu0 %v158_v36  ;;  %84 = vadd.xlane.f32.xlu0 %v83_v38 }
  0x16   :  { %433 = vmatprep.subr.bf16.mxu0 %v525_v0  ;;  %87 = vadd.xlane.f32.xlu1 %v86_v41 }
  0x17   :  { %501 = vmatpush3.bf16.msra.mxu1 %v144_v37 }
  0x18   :  { %503 = vmatprep.subr.bf16.mxu1 %v145_v44 }
  0x19   :  { %90 = vadd.xlane.f32.xlu0 %v89_v45 }
  0x1a   :  { %93 = vadd.xlane.f32.xlu1 %v92_v48 }
  0x1b   :  { %505 = vmatpush3.bf16.msra.mxu1 %v145_v44 }
  0x1c   :  { %507 = vmatprep.subr.bf16.mxu1 %v146_v52 }
  0x1d   :  { %434 = vmatpush3.bf16.xpose.msra.mxu0 %v161_v51  ;;  %96 = vadd.xlane.f32.xlu0 %v95_v53 }
  0x1e   :  { %435 = vmatprep.subr.bf16.mxu0 %v525_v0  ;;  %99 = vadd.xlane.f32.xlu1 %v98_v56 }
  0x1f   :  { %509 = vmatpush3.bf16.msra.mxu1 %v146_v52 }
  0x20   :  { %511 = vmatprep.subr.bf16.mxu1 %v147_v59 }
  0x21   :  { %102 = vadd.xlane.f32.xlu0 %v101_v60 }
  0x22   :  { %105 = vadd.xlane.f32.xlu1 %v104_v63 }
  0x23   :  { %513 = vmatpush3.bf16.msra.mxu1 %v147_v59 }
  0x25   :  { %436 = vmatpush3.bf16.xpose.msra.mxu0 %v164_v2  ;;  %38 = vadd.xlane.f32.xlu0 %v37_v3 }
  0x26   :  { %437 = vmatprep.subr.bf16.mxu0 %v525_v0  ;;  %41 = vadd.xlane.f32.xlu1 %v40_v4 }
  0x2d   :  { %438 = vmatpush3.bf16.xpose.msra.mxu0 %v167_v5 }
  0x2e   :  { %439 = vmatprep.subr.bf16.mxu0 %v525_v0 }
  0x35   :  { %440 = vmatpush3.bf16.xpose.msra.mxu0 %v170_v6 }
  0x36   :  { %441 = vmatprep.subr.bf16.mxu0 %v525_v0 }
  0x3d   :  { %442 = vmatpush3.bf16.xpose.msra.mxu0 %v173_v7 }
  0x44   :  { %444 = vmatmul.mubr.msk.bf16.vlgmr.msra.gmra.mrb[0].mxu0 %vm36_vm0, %v139_v8  ;;  %v527_v8 = vmov 1.0  }
  0x92   :  { %v61_v9 = vpop.xlane.xlu0 %60 }
  0x93   :  { %107 = vxpose.xlu0.b32.start [1/16] (narrow) %v61_v9, 8  ;;  %v67_v11 = vpop.xlane.xlu1 %66 }
  0x96   :  { %v64_v10 = vpop.xlane.xlu0 %63 }
  0x97   :  { %108 = vxpose.xlu0.b32.cont [2/16] (narrow) %v64_v10, 8  ;;  %v70_v12 = vpop.xlane.xlu1 %69 }
  0x9a   :  { %v73_v13 = vpop.xlane.xlu0 %72 }
  0x9b   :  { %109 = vxpose.xlu0.b32.cont [3/16] (narrow) %v67_v11, 8  ;;  %v76_v14 = vpop.xlane.xlu1 %75 }
  0x9e   :  { %v79_v15 = vpop.xlane.xlu0 %78 }
  0x9f   :  { %110 = vxpose.xlu0.b32.cont [4/16] (narrow) %v70_v12, 8  ;;  %v82_v0 = vpop.xlane.xlu1 %81 }
  0xa2   :  { %v85_v16 = vpop.xlane.xlu0 %84 }
  0xa3   :  { %111 = vxpose.xlu0.b32.cont [5/16] (narrow) %v73_v13, 8  ;;  %v88_v17 = vpop.xlane.xlu1 %87 }
  0xa6   :  { %v91_v18 = vpop.xlane.xlu0 %90 }
  0xa7   :  { %112 = vxpose.xlu0.b32.cont [6/16] (narrow) %v76_v14, 8  ;;  %v94_v19 = vpop.xlane.xlu1 %93 }
  0xaa   :  { %v97_v20 = vpop.xlane.xlu0 %96 }
  0xab   :  { %113 = vxpose.xlu0.b32.cont [7/16] (narrow) %v79_v15, 8  ;;  %v100_v21 = vpop.xlane.xlu1 %99 }
  0xae   :  { %v103_v22 = vpop.xlane.xlu0 %102 }
  0xaf   :  { %114 = vxpose.xlu0.b32.cont [8/16] (narrow) %v82_v0, 8  ;;  %v106_v23 = vpop.xlane.xlu1 %105 }
  0xb2   :  { %v39_v26 = vpop.xlane.xlu0 %38 }
  0xb3   :  { %115 = vxpose.xlu0.b32.cont [9/16] (narrow) %v85_v16, 8  ;;  %v42_v35 = vpop.xlane.xlu1 %41 }
  0xb7   :  { %116 = vxpose.xlu0.b32.cont [10/16] (narrow) %v88_v17, 8 }
  0xbb   :  { %117 = vxpose.xlu0.b32.cont [11/16] (narrow) %v91_v18, 8 }
  0xbf   :  { %118 = vxpose.xlu0.b32.cont [12/16] (narrow) %v94_v19, 8 }
  0xc3   :  { %119 = vxpose.xlu0.b32.cont [13/16] (narrow) %v97_v20, 8 }
  0xc7   :  { %120 = vxpose.xlu0.b32.cont [14/16] (narrow) %v100_v21, 8 }
  0xcb   :  { %121 = vxpose.xlu0.b32.cont [15/16] (narrow) %v103_v22, 8 }
  0xcf   :  { %122 = vxpose.xlu0.b32.end [16/16] (narrow) %v106_v23, 8 }
 0x113   :  { %v123_v28 = vpop.trf.xlu0 }
 0x114   :  { %v223_v33 = vrot.slane %v123_v28, %v222_v27 }
 0x117   :  { %v209_v29 = vpop.f32.mrb[0].mxu0 }
 0x118   :  { %v216_v31 = vmul.f32 2.0, %v209_v29  ;;  %v445_v32 = vpop.f32.mrb[1].mxu0 }
 0x119   :  { %v212_v34 = vpop.f32.mrb[2].mxu0 }
 0x11a   :  { %v218_v36 = vsub.f32 %v39_v26, %v216_v31  ;;  %v217_v37 = vmul.f32 2.0, %v212_v34  ;;  %v446_v38 = vpop.f32.mrb[3].mxu0 }
 0x11c   :  { %v224_v39 = vadd.f32 %v223_v33, %v218_v36  ;;  %v219_v40 = vsub.f32 %v42_v35, %v217_v37 }
 0x11e   :  { %v225_v41 = vadd.f32 %v223_v33, %v219_v40  ;;  %v229_v42 = vsel %vm228_vm2, %v224_v39, 1e+30 }
 0x11f   :  { %257 = vmin.xlane.f32.xlu1 %v229_v42  ;;  %v231_v43 = vsub.f32 0.0, %v229_v42 }
 0x120   :  { %v230_v44 = vsel %vm228_vm2, %v225_v41, 1e+30 }
 0x121   :  { %233 = vst [vmem:[%s691_s2] sm:$0xff] %v231_v43  ;;  %v232_v45 = vsub.f32 0.0, %v230_v44 }
 0x123   :  { %259 = vmin.xlane.f32.xlu1 %v230_v44  ;;  %234 = vst [vmem:[%s691_s2 + $0x8] sm:$0xff] %v232_v45 }
 0x1ac   :  { %v258_v46 = vpop.xlane.xlu1 %257 }
 0x1ad   :  { %vm261_vm3 = vcmp.le.f32.partialorder %v229_v42, %v258_v46 }
 0x1ae   :  { %v263_v47 = vsel %vm261_vm3, %v648_v30, 128 }
 0x1af   :  { %v266_v48 = vshra.s32 %v263_v47, 16  ;;  %v265_v54 = vand.u32 65535, %v263_v47 }
 0x1b0   :  { %v260_v49 = vpop.xlane.xlu1 %259 }
 0x1b1   :  { %vm262_vm4 = vcmp.le.f32.partialorder %v230_v44, %v260_v49  ;;  %v268_v50 = vcvt.s32.f32 %v266_v48  ;;  %v267_v57 = vcvt.s32.f32 %v265_v54 }
 0x1b2   :  { %v264_v51 = vsel %vm262_vm4, %v648_v30, 128 }
 0x1b3   :  { %269 = vmin.xlane.f32.xlu1 %v268_v50  ;;  %v280_v52 = vshra.s32 %v264_v51, 16  ;;  %v279_v55 = vand.u32 65535, %v264_v51 }
 0x1b5   :  { %v282_v53 = vcvt.s32.f32 %v280_v52  ;;  %v281_v60 = vcvt.s32.f32 %v279_v55 }
 0x1b7   :  { %283 = vmin.xlane.f32.xlu1 %v282_v53 }
 0x240   :  { %v270_v56 = vpop.xlane.xlu1 %269 }
 0x241   :  { %vm271_vm5 = vcmp.eq.f32.partialorder %v268_v50, %v270_v56  ;;  %v276_v62 = vcvt.f32.s32 %v270_v56 }
 0x242   :  { %v272_v58 = vsel %vm271_vm5, %v267_v57, inf }
 0x243   :  { %273 = vmin.xlane.f32.xlu1 %v272_v58  ;;  %v277_v1 = vshll.u32 %v276_v62, 16 }
 0x244   :  { %v284_v59 = vpop.xlane.xlu1 %283 }
 0x245   :  { %vm285_vm6 = vcmp.eq.f32.partialorder %v282_v53, %v284_v59  ;;  %v290_v2 = vcvt.f32.s32 %v284_v59 }
 0x246   :  { %v286_v61 = vsel %vm285_vm6, %v281_v60, inf }
 0x247   :  { %287 = vmin.xlane.f32.xlu1 %v286_v61  ;;  %v291_v6 = vshll.u32 %v290_v2, 16 }
 0x24b   :  { %235 = vmax.xlane.f32.xlu1 %v231_v43 }
 0x24f   :  { %237 = vmax.xlane.f32.xlu1 %v232_v45 }
 0x2d0   :  { %v274_v63 = vpop.xlane.xlu1 %273 }
 0x2d1   :  { %v275_v3 = vcvt.f32.s32 %v274_v63 }
 0x2d3   :  { %v278_v4 = vadd.s32 %v277_v1, %v275_v3 }
 0x2d4   :  { %v288_v5 = vpop.xlane.xlu1 %287 }
 0x2d5   :  { %v289_v7 = vcvt.f32.s32 %v288_v5  ;;  %294 = vst.msk [vmem:[%s692_s4] sm:$0xff] %vm293_vm7, %v278_v4  ;;  %vm296_vm8 = vcmp.eq.s32.totalorder %v278_v4, %v648_v30 }
 0x2d6   :  { %479 = vmatprep.mubr.msk.f32.mxu1 %vm296_vm8, %v527_v8 }
 0x2d7   :  { %v292_v9 = vadd.s32 %v291_v6, %v289_v7 }
 0x2d8   :  { %v236_v10 = vpop.xlane.xlu1 %235 }
 0x2d9   :  { %295 = vst.msk [vmem:[%s692_s4 + $0x8] sm:$0xff] %vm293_vm7, %v292_v9  ;;  %v239_v11 = vsub.f32 %v231_v43, %v236_v10  ;;  %vm297_vm9 = vcmp.eq.s32.totalorder %v292_v9, %v648_v30 }
 0x2da   :  { %480 = vmatmul.mubr.msk.f32.vlgmr.msra.gmra.mrb[0].mxu1 %vm297_vm9, %v527_v8 }
 0x2db   :  { %v241_v12 = vmul.f32 1.442695, %v239_v11 }
 0x2dc   :  { %v238_v13 = vpop.xlane.xlu1 %237 }
 0x2dd   :  { %517 = vpow2.f32 %v241_v12  ;;  %v240_v14 = vsub.f32 %v232_v45, %v238_v13 }
 0x2df   :  { %v243_v15 = vmul.f32 1.442695, %v240_v14 }
 0x2e1   :  { %519 = vpow2.f32 %v243_v15 }
 0x2e7   :  { %v518_v0 = vpop.eup %517 }
 0x2e8   :  { %v245_v16 = vsel %vm228_vm2, %v518_v0, 0.0 }
 0x2e9   :  { %247 = vadd.xlane.f32.xlu1 %v245_v16 }
 0x2eb   :  { %v520_v17 = vpop.eup %519 }
 0x2ec   :  { %v246_v18 = vsel %vm228_vm2, %v520_v17, 0.0 }
 0x2ed   :  { %249 = vadd.xlane.f32.xlu1 %v246_v18 }
 0x376   :  { %v248_v19 = vpop.xlane.xlu1 %247 }
 0x377   :  { %521 = vrcp.f32 %v248_v19 }
 0x37a   :  { %v250_v20 = vpop.xlane.xlu1 %249 }
 0x37b   :  { %523 = vrcp.f32 %v250_v20 }
 0x381   :  { %v522_v21 = vpop.eup %521 }
 0x382   :  { %v253_v22 = vmul.f32 %v522_v21, %v245_v16 }
 0x384   :  { %255 = vst [vmem:[%s693_s3] sm:$0xff] %v253_v22 }
 0x385   :  { %v524_v23 = vpop.eup %523 }
 0x386   :  { %v254_v24 = vmul.f32 %v524_v23, %v246_v18 }
 0x388   :  { %256 = vst [vmem:[%s693_s3 + $0x8] sm:$0xff] %v254_v24 }
 0x3ad   :  { %v481_v25 = vpop.f32.mrb[0].mxu1 }
 0x3ae   :  { %378 = vst.msk [vmem:[%s694_s5 + $0x8] sm:$0xff] %vm36_vm0, %v481_v25  ;;  %v368_v26 = vpop.f32.mrb[1].mxu1 }
 0x3af   :  { %377 = vst.msk [vmem:[%s694_s5] sm:$0xff] %vm36_vm0, %v368_v26 }

// kernel: structure_tokenizer_forward.7
= control target key start
LH: loop header
LB: loop body
LE: loop exit
PB: predicated region body
PF: predicated region fallthrough
CT: control target
= control target key end

     0   :  { %11 = vsyncpa [#allocation3], 0  ;;  %s1106_s0 = inlined_call_operand.vmem [shape: f32[2,8,16], index: 0, kind: input, shape index: {}]   ;;  %s1107_s1 = inlined_call_operand.vmem [shape: f32[2,8,16], index: 1, kind: input, shape index: {}]   ;;  %s1108_s2 = inlined_call_operand.vmem [shape: f32[16,64], index: 2, kind: input, shape index: {}]   ;;  %s1109_s3 = inlined_call_operand.vmem [shape: f32[1,64], index: 3, kind: input, shape index: {}]   ;;  %s1110_s4 = inlined_call_operand.hbm [shape: f32[2,8,8,16], index: 4, kind: output, shape index: {0}]   ;;  %s1111_s5 = inlined_call_operand.hbm [shape: f32[2,8,8,64], index: 5, kind: output, shape index: {1}]  }
   0x1   :  { %13 = vsyncpa [#allocation3 + $0x1], 0 }
   0x2   :  { %14 = vsyncpa [#allocation5], 0 }
   0x3   :  { %16 = vsyncpa [#allocation5 + $0x1], 0  ;;  %s900_s18 = smov 0   ;;  %s902_s19 = smov 0  }
   0x4   :  { %s904_s20 = smov 0   ;;  %s906_s21 = smov 0  }
   0x5   :  { %s908_s22 = smov 0   ;;  %s910_s23 = smov 0  }
   0x6 LB: > { %s649_s24 = sadd.s32 4294967295, %s863_s23   ;;  %s650_s25 = sadd.s32 4294967294, %s863_s23   ;;  %s863_s23 = sphi %s910_s23, %s22_s23   ;;  %s859_s22 = sphi %s908_s22, %s1118_s22   ;;  %s855_s21 = sphi %s906_s21, %s1117_s21   ;;  %s851_s20 = sphi %s904_s20, %s1116_s20   ;;  %s847_s19 = sphi %s902_s19, %s1115_s19   ;;  %s843_s18 = sphi %s900_s18, %s1114_s18  }
   0x7   : > { %s34_s26 = sadd.s32 1, %s859_s22  ;;  %s139_s27 = sadd.s32 1, %s851_s20 }
   0x8   : > { %p36_p0 = scmp.ge.s32.totalorder %s34_s26, 2  ;;  %p149_p1 = scmp.ne.s32.totalorder %s851_s20, %s847_s19 }
   0x9   : > { %p150_p2 = scmp.eq.s32.totalorder %s649_s24, 1  ;;  %p155_p3 = scmp.ne.s32.totalorder %s847_s19, %s843_s18 }
   0xa   : > { %s1120_s26 = smov (%p36_p0, %s34_s26), 0  ;;  %p156_p5 = scmp.eq.s32.totalorder %s650_s25, 1 }
   0xb   : > { %p940_p4 = por %p150_p2, %p149_p1  ;;  %s134_s29 = ssub.s32 %s859_s22, %s1120_s26 }
   0xc   : > { %p653_p6 = scmp.ge.s32.totalorder %s863_s23, 1  ;;  %p137_p7 = scmp.eq.s32.totalorder %s134_s29, 0 }
   0xd   : > { %p947_p8 = por %p156_p5, %p155_p3  ;;  %p225_p9 = scmp.lt.s32.totalorder %s863_s23, 3 }
   0xe   : > { %s953_s6 = scalar_select %p137_p7, %s851_s20, %s139_s27  }
   0xf   : > { %p226_p10 = pnand %p653_p6, %p225_p9 }
  0x10   : > { %v391_v0 = vld [vmem:[%s1108_s2] sm:$0xff] (!%p226_p10)  ;;  %v392_v1 = vld [vmem:[%s1108_s2 + $0x8] sm:$0xff] (!%p226_p10)  ;;  %p264_p11 = scmp.lt.s32.totalorder (!%p226_p10), %s855_s21, 1  ;;  %v285_v2 = vlaneseq (!%p226_p10)  ;;  %v865_v4 = vmov (!%p226_p10), 1966171168   ;;  %s970_s25 = sand.u32 (!%p226_p10), 1, %s847_s19  }
  0x11   : > { %229 = sbr.rel (%p226_p10) target bundleno = 277 (0x115), region = 36  ;;  %v393_v3 = vpack.c.bf16 (!%p226_p10), %v392_v1, %v391_v0  ;;  %v283_v5 = vunpack.c.l.s4 (!%p226_p10), %v865_v4  ;;  %s654_s27 = sshll.u32 (!%p226_p10), %s970_s25, 6  ;;  %vm378_vm0 = vcmask (!%p226_p10), 130048  }
  0x12   : > { %v286_v6 = vshrl.u32 (!%p226_p10), %v285_v2, 7  ;;  %s975_s29 = scalar_lea.vmem (!%p226_p10), [#allocation2], %s654_s27  ;;  %s671_s7 = sshll.u32 (!%p226_p10), %s855_s21, 10 }
  0x13   : > { %678 = vmatprep.subr.bf16.mxu0 (!%p226_p10), %v393_v3  ;;  %688 = vmatprep.subr.bf16.mxu1 (!%p226_p10), %v393_v3  ;;  %v284_v7 = vunpack.c.0.s8 (!%p226_p10), %v283_v5  ;;  %s508_s8 = sshll.u32 (!%p226_p10), %s975_s29, 4  ;;  %s866_s14 = smov (!%p226_p10), [#allocation2]   ;;  %s1006_s8 = int_to_ptr.vmem [resolvable:$true] %s508_s8 }
  0x14   : > { %679 = vmatpush3.bf16.msra.mxu0 (!%p226_p10), %v393_v3  ;;  %689 = vmatpush3.bf16.msra.mxu1 (!%p226_p10), %v393_v3  ;;  %v332_v11 = vsub.s32 (!%p226_p10), 0, %v286_v6  ;;  %s753_s13 = scalar_lea.vmem (!%p226_p10), %s1006_s8, 1024 }
  0x15   : > { %v287_v8 = vsub.s32 (!%p226_p10), %v284_v7, %v286_v6  ;;  %p754_p12 = scmp.ne.s32.totalorder (!%p226_p10), %s1006_s8, %s753_s13 }
  0x17   : > { %p755_p13 = pnand (!%p226_p10), %p754_p12, %p940_p4 }
  0x18   : > { %s265_s11 = scalar_select %p264_p11, %s855_s21, 1 }
  0x19   : > { %p756_p0 = pneg %p755_p13 }
  0x1a   : > { %s656_s12 = sshll.u32 %s265_s11, 3  ;;  %s1004_s11 = scalar_lea.hbm %s1110_s4, %s671_s7 }
  0x1b   : > { %s270_s15 = scalar_lea.vmem %s1106_s0, %s656_s12  ;;  %s274_s24 = scalar_lea.vmem %s1107_s1, %s656_s12 }
  0x1c   : > { %v278_v9 = vld [vmem:[%s270_s15] sm:$0xff]  ;;  %s488_s12 = scalar_lea.sflag [#allocation3], %s970_s25  ;;  %s757_s15 = sshll.u32 %s866_s14, 4  ;;  %s758_s15 = int_to_ptr.vmem [resolvable:$false] %s757_s15 }
  0x1d   : > { %v288_v10 = vrot.slane %v278_v9, %v287_v8  ;;  %v281_v12 = vcombine.high %v278_v9, %v278_v9  ;;  %v279_v16 = vld [vmem:[%s274_s24] sm:$0xff]  ;;  %s759_s16 = scalar_lea.vmem %s758_s15, 2048  ;;  %p760_p1 = scmp.lt.s32.totalorder %s1006_s8, %s758_s15 }
  0x1e   : > { %p761_p2 = scmp.lt.s32.totalorder %s759_s16, %s753_s13 }
  0x1f   : > { %v296_v13 = vcombine.high %v288_v10, %v288_v10  ;;  %v304_v14 = vrot.slane %v288_v10, %v287_v8  ;;  %v295_v15 = vrot.slane %v281_v12, %v287_v8 }
  0x20   : > { %p762_p3 = por %p761_p2, %p760_p1 }
  0x21   : > { %v318_v17 = vrot.slane %v296_v13, %v287_v8  ;;  %v326_v18 = vcombine.high %v304_v14, %v304_v14  ;;  %v333_v19 = vrot.slane %v304_v14, %v332_v11  ;;  %v297_v20 = vcombine.high %v295_v15, %v295_v15 }
  0x22   : > { %v311_v21 = vrot.slane %v295_v15, %v287_v8  ;;  %p763_p5 = pnand %p762_p3, %p756_p0 }
  0x23   : > { %v328_v22 = vcombine.high %v318_v17, %v318_v17  ;;  %v337_v23 = vrot.slane %v318_v17, %v332_v11  ;;  %v370_v24 = vadd.f32 %v333_v19, %v279_v16  ;;  %v341_v25 = vrot.slane %v326_v18, %v332_v11 }
  0x24   : > { %v325_v26 = vrot.slane %v297_v20, %v287_v8  ;;  %v327_v27 = vcombine.high %v311_v21, %v311_v21  ;;  %v349_v28 = vrot.slane %v311_v21, %v332_v11 }
  0x25   : > { %v371_v29 = vadd.f32 %v337_v23, %v279_v16  ;;  %379 = vst.msk [vmem:[%s975_s29] sm:$0xff] %vm378_vm0, %v370_v24  ;;  %v345_v30 = vrot.slane %v328_v22, %v332_v11  ;;  %v372_v31 = vadd.f32 %v341_v25, %v279_v16 }
  0x26   : > { %v329_v32 = vcombine.high %v325_v26, %v325_v26  ;;  %v353_v33 = vrot.slane %v325_v26, %v332_v11  ;;  %v374_v34 = vadd.f32 %v349_v28, %v279_v16  ;;  %v357_v35 = vrot.slane %v327_v27, %v332_v11 }
  0x27   : > { %380 = vst.msk [vmem:[%s975_s29 + $0x8] sm:$0xff] %vm378_vm0, %v371_v29  ;;  %v387_v36 = vpack.c.bf16 %v371_v29, %v370_v24  ;;  %v373_v37 = vadd.f32 %v345_v30, %v279_v16  ;;  %381 = vst.msk [vmem:[%s975_s29 + $0x10] sm:$0xff] %vm378_vm0, %v372_v31 }
  0x28   : > { %v375_v38 = vadd.f32 %v353_v33, %v279_v16  ;;  %383 = vst.msk [vmem:[%s975_s29 + $0x20] sm:$0xff] %vm378_vm0, %v374_v34  ;;  %v361_v39 = vrot.slane %v329_v32, %v332_v11  ;;  %v376_v40 = vadd.f32 %v357_v35, %v279_v16 }
  0x29   : > { %680 = vmatprep.mubr.msk.bf16.mxu0 %vm378_vm0, %v387_v36  ;;  %382 = vst.msk [vmem:[%s975_s29 + $0x18] sm:$0xff] %vm378_vm0, %v373_v37  ;;  %v388_v41 = vpack.c.bf16 %v373_v37, %v372_v31 }
  0x2a   : > { %384 = vst.msk [vmem:[%s975_s29 + $0x28] sm:$0xff] %vm378_vm0, %v375_v38  ;;  %v389_v42 = vpack.c.bf16 %v375_v38, %v374_v34  ;;  %v377_v43 = vadd.f32 %v361_v39, %v279_v16  ;;  %385 = vst.msk [vmem:[%s975_s29 + $0x30] sm:$0xff] %vm378_vm0, %v376_v40 }
  0x2b   : > { %681 = vmatmul.mubr.msk.bf16.vlgmr.msra.gmra.mrb[0].mxu0 %vm378_vm0, %v388_v41 }
  0x2c   : > { %684 = vmatprep.mubr.msk.bf16.mxu1 %vm378_vm0, %v389_v42  ;;  %386 = vst.msk [vmem:[%s975_s29 + $0x38] sm:$0xff] %vm378_vm0, %v377_v43  ;;  %v390_v44 = vpack.c.bf16 %v377_v43, %v376_v40 }
  0x2e   : > { %685 = vmatmul.mubr.msk.bf16.vlgmr.msra.gmra.mrb[0].mxu1 %vm378_vm0, %v390_v44 }
  0x2f   : > { %766 = shalt.err (!%p763_p5)
}
  0x30   : > { %s767_s17 = scalar_lea.hbm %s1004_s11, 1024  ;;  %s771_s9 = scalar_lea.hbm %s1110_s4, 2048 }
  0x31   : > { %p768_p6 = scmp.ne.s32.totalorder %s1004_s11, %s767_s17  ;;  %p772_p10 = scmp.lt.u32.totalorder %s1004_s11, %s1110_s4 }
  0x32   : > { %p773_p11 = scmp.lt.u32.totalorder %s771_s9, %s767_s17  ;;  %p775_p13 = scmp.lt.u32.totalorder %s767_s17, %s1004_s11 }
  0x33   : > { %p769_p7 = pnand %p768_p6, %p940_p4 }
  0x34   : > { %p774_p12 = por %p773_p11, %p772_p10 }
  0x35   : > { %p770_p9 = pneg %p769_p7 }
  0x36   : > { %p776_p0 = por %p775_p13, %p774_p12 }
  0x38   : > { %p777_p1 = pnand %p776_p0, %p770_p9 }
  0x3a   : > { %780 = shalt.err (!%p777_p1)
}
  0x3b   : > { %s867_s13 = smov 128   ;;  %s868_s15 = smov 8   ;;  %v658_v45 = vld [vmem:[%s1109_s3] ss:$0 sm:$0xff]  ;;  %vm478_vm1 = vcmask 523264  }
  0x3c   : > { %690 = dma.vmem_to_hbm [thread:$0]  (%p940_p4), %s1006_s8, 1024, %s1004_s11, %s488_s12, %s867_s13, %s867_s13, %s868_s15  }
  0x3d   : > { %s263_s17 = scalar_lea.vmem [#allocation4], %s654_s27  ;;  %s1051_s12 = scalar_lea.hbm %s1111_s5, %s671_s7 }
  0x3e   : > { %s526_s8 = sshll.u32 %s263_s17, 4  ;;  %s493_s29 = scalar_lea.sflag [#allocation5], %s970_s25  ;;  %s1053_s8 = int_to_ptr.vmem [resolvable:$true] %s526_s8 }
  0x3f   : > { %s781_s9 = scalar_lea.vmem %s1053_s8, 1024  ;;  %s869_s21 = smov [#allocation4]  }
  0x40   : > { %p782_p2 = scmp.ne.s32.totalorder %s1053_s8, %s781_s9  ;;  %s785_s10 = sshll.u32 %s869_s21, 4  ;;  %s786_s10 = int_to_ptr.vmem [resolvable:$false] %s785_s10 }
  0x41   : > { %s787_s7 = scalar_lea.vmem %s786_s10, 2048  ;;  %p788_p6 = scmp.lt.s32.totalorder %s1053_s8, %s786_s10 }
  0x42   : > { %p783_p3 = pnand %p782_p2, %p940_p4  ;;  %p789_p7 = scmp.lt.s32.totalorder %s787_s7, %s781_s9 }
  0x44   : > { %p784_p5 = pneg %p783_p3  ;;  %p790_p9 = por %p789_p7, %p788_p6 }
  0x46   : > { %p791_p10 = pnand %p790_p9, %p784_p5 }
  0xfe   : > { %v682_v46 = vpop.f32.mrb[0].mxu0 }
  0xff   : > { %v456_v47 = vadd.f32 %v682_v46, %v658_v45  ;;  %v447_v48 = vpop.f32.mrb[1].mxu0 }
 0x100   : > { %v448_v49 = vadd.f32 %v658_v45, %v447_v48  ;;  %v683_v50 = vpop.f32.mrb[2].mxu0 }
 0x101   : > { %481 = vst.msk [vmem:[%s263_s17 + $0x10] sm:$0xff] %vm478_vm1, %v456_v47  ;;  %v459_v51 = vadd.f32 %v683_v50, %v658_v45  ;;  %v686_v52 = vpop.f32.mrb[0].mxu1  ;;  %v450_v53 = vpop.f32.mrb[3].mxu0 }
 0x102   : > { %479 = vst.msk [vmem:[%s263_s17] sm:$0xff] %vm478_vm1, %v448_v49  ;;  %v472_v54 = vadd.f32 %v686_v52, %v658_v45  ;;  %v451_v55 = vadd.f32 %v658_v45, %v450_v53  ;;  %v463_v56 = vpop.f32.mrb[1].mxu1 }
 0x103   : > { %482 = vst.msk [vmem:[%s263_s17 + $0x18] sm:$0xff] %vm478_vm1, %v459_v51  ;;  %v464_v57 = vadd.f32 %v658_v45, %v463_v56  ;;  %v687_v58 = vpop.f32.mrb[2].mxu1 }
 0x104   : > { %485 = vst.msk [vmem:[%s263_s17 + $0x30] sm:$0xff] %vm478_vm1, %v472_v54  ;;  %480 = vst.msk [vmem:[%s263_s17 + $0x8] sm:$0xff] %vm478_vm1, %v451_v55  ;;  %v475_v59 = vadd.f32 %v687_v58, %v658_v45  ;;  %v466_v60 = vpop.f32.mrb[3].mxu1 }
 0x105   : > { %483 = vst.msk [vmem:[%s263_s17 + $0x20] sm:$0xff] %vm478_vm1, %v464_v57  ;;  %v467_v61 = vadd.f32 %v658_v45, %v466_v60 }
 0x106   : > { %486 = vst.msk [vmem:[%s263_s17 + $0x38] sm:$0xff] %vm478_vm1, %v475_v59 }
 0x107   : > { %484 = vst.msk [vmem:[%s263_s17 + $0x28] sm:$0xff] %vm478_vm1, %v467_v61 }
 0x108   : > { %794 = shalt.err (!%p791_p10)
}
 0x109   : > { %s795_s14 = scalar_lea.hbm %s1051_s12, 1024  ;;  %s799_s17 = scalar_lea.hbm %s1111_s5, 2048 }
 0x10a   : > { %p796_p11 = scmp.ne.s32.totalorder %s1051_s12, %s795_s14  ;;  %p800_p0 = scmp.lt.u32.totalorder %s1051_s12, %s1111_s5 }
 0x10b   : > { %p801_p1 = scmp.lt.u32.totalorder %s799_s17, %s795_s14  ;;  %p803_p3 = scmp.lt.u32.totalorder %s795_s14, %s1051_s12 }
 0x10c   : > { %p797_p12 = pnand %p796_p11, %p940_p4 }
 0x10d   : > { %p802_p2 = por %p801_p1, %p800_p0 }
 0x10e   : > { %p798_p13 = pneg %p797_p12 }
 0x10f   : > { %p804_p5 = por %p803_p3, %p802_p2 }
 0x111   : > { %p805_p6 = pnand %p804_p5, %p798_p13 }
 0x113   : > { %808 = shalt.err (!%p805_p6)
}
 0x114   : > { %691 = dma.vmem_to_hbm [thread:$0]  (%p940_p4), %s1053_s8, 1024, %s1051_s12, %s493_s29, %s867_s13, %s867_s13, %s868_s15  }
 0x115 PF: > { %p701_p7 = scmp.ge.s32.totalorder %s863_s23, 2  ;;  %s541_s9 = sand.u32 1, %s843_s18  }
 0x116   : > { %s542_s21 = scalar_lea.sflag [#allocation3], %s541_s9 }
 0x117   : > { %p695_p9 = pnand %p701_p7, %p947_p8 }
 0x119   : > { %834 = dma.done.wait (!%p695_p9), %s542_s21, 1024  }
 0x11a   : > { %836 = vsyncadd (!%p695_p9), %s542_s21, 4294966272  ;;  %s551_s28 = scalar_lea.sflag [#allocation5], %s541_s9 }
 0x11b   : > { %838 = dma.done.wait (!%p695_p9), %s551_s28, 1024  }
 0x11c   : > { %840 = vsyncadd (!%p695_p9), %s551_s28, 4294966272  ;;  %s22_s23 = sadd.s32 1, %s863_s23   ;;  %s1114_s18 = smov %s847_s19 }
 0x11d   : > { %p19_p10 = scmp.ge.s32.totalorder %s22_s23, 4   ;;  %s1115_s19 = smov %s851_s20 }
 0x11e   : > { %s1116_s20 = smov %s953_s6  ;;  %s1117_s21 = smov %s859_s22 }
 0x11f   : > { %s1118_s22 = smov %s1120_s26  ;;  %21 = sbr.rel (!%p19_p10) target bundleno = 6 (0x6), region = 91 }
 0x126   :  { %556 = vsyncpa [#allocation3], 1 }
 0x127   :  { %558 = vsyncpa [#allocation3 + $0x1], 1 }
 0x128   :  { %559 = vsyncpa [#allocation5], 1 }
 0x129   :  { %561 = vsyncpa [#allocation5 + $0x1], 1 }

</bundles_post_ra>
